<compile_context>
chip_gen: v5e
topology: v5e:2x2
jax: 0.10.0
libtpu: 0.0.40
codegen_flags: <defaults>
</compile_context>

<pallas_src>
import functools
import math

import jax
import jax.numpy as jnp
from jax import lax
from jax.experimental import pallas as pl
from jax.experimental.pallas import tpu as pltpu


# ---------------------------------------------------------------------------
# Generation-aware VMEM budgeting
# ---------------------------------------------------------------------------
def _tpu_vmem_budget():
    """Returns (vmem_limit_bytes, is_v7x)."""
    kind = ""
    try:
        kind = jax.devices()[0].device_kind.lower()
    except Exception:
        pass
    if "v7" in kind:
        # v7x has only 64 MiB physical VMEM per TensorCore -> keep the scoped limit tight.
        return 40 * 1024 * 1024, True
    # v5e / v6e: 128 MiB physical VMEM.
    return 64 * 1024 * 1024, False


def _pick_tile_h(C, H, W, logits_itemsize, depth_itemsize, scratch_itemsize,
                 budget_bytes, align):
    """Largest aligned H tile whose real per-step VMEM footprint fits the budget.

    Per-step footprint per row: 2x double-buffered logits block (native dtype)
    + 2x double-buffered depth block + e_scratch + ~8 live full-tile f32
    temporaries (shift, inv_sum, target, acc, fg, ...).
    """
    if H <= align:
        return H
    per_row = W * (2 * C * logits_itemsize + 2 * depth_itemsize
                   + scratch_itemsize * C + 8 * 4)
    max_rows = (int(budget_bytes) // per_row) // align * align
    if max_rows < align:
        return align
    if max_rows >= H:
        return H
    # Choose the tile minimizing (padded rows + per-step overhead); the per-step
    # pipeline overhead (~0.35 us) is modeled as ~4 extra rows of work.
    best_t, best_cost = align, None
    t = align
    while t <= max_rows:
        n_steps = -(-H // t)
        cost = n_steps * (t + 4)
        if best_cost is None or cost <= best_cost:
            best_t, best_cost = t, cost
        t += align
    return best_t


# ---------------------------------------------------------------------------
# Kernel
# ---------------------------------------------------------------------------
def _ddn_loss_kernel(boxes_ref,            # SMEM (B*N*4,) int32  u1,v1,u2,v2 per box
                     logits_ref,           # VMEM (C, tH, W)  native dtype
                     depth_ref,            # VMEM (tH, W)     native dtype
                     out_ref,              # VMEM (8, 128)    f32 partials
                     e_scratch,            # VMEM (C, tH, W)  bf16/f32 softmax numerators
                     *,
                     alpha, gamma, fg_weight, bg_weight,
                     depth_min, depth_max, num_bins, mode,
                     num_boxes, height, ch_unroll, box_unroll, padded_tail):
    C = num_bins + 1
    b = pl.program_id(0)
    t = pl.program_id(1)

    depth = depth_ref[...].astype(jnp.float32)           # (tH, W)
    tH, W = depth.shape

    # ---- transform_utils.bin_depths(..., target=True) ----------------------
    if mode == "UD":
        bin_size = (depth_max - depth_min) / num_bins
        indices = (depth - depth_min) * (1.0 / bin_size)
    elif mode == "LID":
        bin_size = 2.0 * (depth_max - depth_min) / (num_bins * (1 + num_bins))
        indices = -0.5 + 0.5 * jnp.sqrt(1.0 + (8.0 / bin_size) * (depth - depth_min))
    elif mode == "SID":
        indices = num_bins * (jnp.log(1.0 + depth) - math.log(1.0 + depth_min)) / (
            math.log(1.0 + depth_max) - math.log(1.0 + depth_min))
    else:
        raise NotImplementedError(mode)
    # ~isfinite written with comparisons (NaN / +-inf) for safe Mosaic lowering
    bad = ((indices < 0) | (indices > num_bins)
           | (indices != indices) | (jnp.abs(indices) == jnp.inf))
    indices = jnp.where(bad, jnp.float32(num_bins), indices)
    target = indices.astype(jnp.int32)                    # trunc == floor (indices >= 0)

    # ---- FocalLoss(reduction='none'), channel axis streamed in 3 passes ----
    # Pass 1: per-pixel max over channels (VPU only).
    def max_body(c, acc_m):
        return jnp.maximum(acc_m, logits_ref[c].astype(jnp.float32))
    m = lax.fori_loop(0, C, max_body,
                      jnp.full((tH, W), -jnp.inf, jnp.float32), unroll=ch_unroll)

    # Pass 2: exp (the only per-channel transcendental), stash e, accumulate sum.
    def sumexp_body(c, s):
        e = jnp.exp(logits_ref[c].astype(jnp.float32) - m)
        e_scratch[c] = e.astype(e_scratch.dtype)
        return s + e
    sum_e = lax.fori_loop(0, C, sumexp_body,
                          jnp.zeros((tH, W), jnp.float32), unroll=ch_unroll)

    shift = m + jnp.log(sum_e)                            # 1 log / pixel
    inv_sum = pl.reciprocal(sum_e, approx=True)           # 1 recip / pixel (EUP, cheap)

    gamma_is_int = float(gamma) == int(gamma) and gamma >= 0.0
    coeff_fg = jnp.float32(-alpha * (1.0 + 1e-6))         # one-hot channel (+ kornia eps)
    coeff_bg = jnp.float32(-alpha * 1e-6)                 # other channels (kornia eps)

    # Pass 3: focal-loss accumulation (pure VPU per channel) -- the hot loop.
    def focal_body(c, acc):
        logp = logits_ref[c].astype(jnp.float32) - shift          # log-softmax
        p = e_scratch[c].astype(jnp.float32) * inv_sum            # softmax
        if gamma_is_int:
            fw = lax.integer_pow(1.0 - p, int(gamma))
        else:
            # approx reciprocal may push p slightly above 1 -> keep the clamp here
            fw = jnp.power(jnp.maximum(1.0 - p, 0.0), jnp.float32(gamma))
        coeff = jnp.where(target == c, coeff_fg, coeff_bg)
        return acc + coeff * (fw * logp)
    loss_pix = lax.fori_loop(0, C, focal_body,
                             jnp.zeros((tH, W), jnp.float32), unroll=ch_unroll)

    # ---- loss_utils.compute_fg_mask rasterized from SMEM box corners -------
    row_n = t * tH + lax.broadcasted_iota(jnp.int32, (tH, 1), 0)
    col_n = lax.broadcasted_iota(jnp.int32, (1, W), 1)

    def box_body(n, fgacc):
        base = (b * num_boxes + n) * 4
        u1 = boxes_ref[base + 0]
        v1 = boxes_ref[base + 1]
        u2 = boxes_ref[base + 2]
        v2 = boxes_ref[base + 3]
        rmask = ((row_n >= v1) & (row_n < v2)).astype(jnp.float32)   # (tH, 1)
        cmask = ((col_n >= u1) & (col_n < u2)).astype(jnp.float32)   # (1, W)
        return jnp.maximum(fgacc, rmask * cmask)                     # 2 full-tile ops/box
    fg = lax.fori_loop(0, num_boxes, box_body,
                       jnp.zeros((tH, W), jnp.float32), unroll=box_unroll)

    # ---- Balancer weighting + partial reduction -----------------------------
    w = bg_weight + (fg_weight - bg_weight) * fg
    wl = loss_pix * w
    if padded_tail:
        # select (NOT multiply) so NaN/inf from garbage padded rows cannot leak
        row_full = t * tH + lax.broadcasted_iota(jnp.int32, (tH, W), 0)
        wl = jnp.where(row_full < height, wl, 0.0)
    fg_sum = jnp.sum(wl * fg)
    bg_sum = jnp.sum(wl) - fg_sum

    rr = lax.broadcasted_iota(jnp.int32, (8, 128), 0)
    cc = lax.broadcasted_iota(jnp.int32, (8, 128), 1)
    out_ref[...] = jnp.where((rr == 0) & (cc == 0), fg_sum,
                             jnp.where((rr == 0) & (cc == 1), bg_sum, 0.0)
                             ).astype(jnp.float32)


# ---------------------------------------------------------------------------
# Wrapper (DDNLoss.forward)
# ---------------------------------------------------------------------------
def ddn_loss(depth_logits, depth_maps, gt_boxes2d, *,
             weight, alpha, gamma, disc_cfg, fg_weight, bg_weight,
             downsample_factor, tile_h=None):
    """Returns (loss_scalar, tb_dict) matching DDNLoss.forward semantics."""
    B, C, H, W = depth_logits.shape
    num_bins = int(disc_cfg["num_bins"])
    assert C == num_bins + 1
    N = int(gt_boxes2d.shape[1])

    # 2D box corners -> int32 feature-map pixel ranges (tiny; scalar-prefetched).
    boxes = gt_boxes2d.astype(jnp.float32) / float(downsample_factor)
    u1 = jnp.floor(boxes[..., 0])
    v1 = jnp.floor(boxes[..., 1])
    u2 = jnp.ceil(boxes[..., 2])
    v2 = jnp.ceil(boxes[..., 3])
    box_corners = jnp.stack([u1, v1, u2, v2], axis=-1).astype(jnp.int32).reshape(-1)

    vmem_limit, is_v7x = _tpu_vmem_budget()
    align = 16 if H % 16 == 0 else 8
    scratch_isize_est = 2 if align == 16 else 4

    if tile_h is None:
        budget = vmem_limit - 6 * 1024 * 1024   # headroom for compiler scratch
        tile_h = _pick_tile_h(C, H, W,
                              depth_logits.dtype.itemsize,
                              depth_maps.dtype.itemsize,
                              scratch_isize_est, budget, align)
        if is_v7x and (B == 1 or B % 2 == 1) and tile_h >= H and H > align:
            # Guarantee >=2 grid steps along H so both v7x TensorCores get work.
            t = ((-(-H // 2)) + align - 1) // align * align
            while t >= H:
                t -= align
            tile_h = max(align, t)
    assert tile_h == H or tile_h % 8 == 0, "tile_h must be full H or a multiple of 8"
    nH = -(-H // tile_h)
    padded_tail = (nH * tile_h != H)

    # bf16 softmax-numerator scratch when each channel slice is (16,128)-tile aligned.
    e_dtype = jnp.bfloat16 if tile_h % 16 == 0 else jnp.float32

    ch_unroll = C if C <= 16 else 8          # partial unroll for large C (CaDDN C~81)
    box_unroll = max(1, min(N, 8))

    kernel = functools.partial(
        _ddn_loss_kernel,
        alpha=float(alpha), gamma=float(gamma),
        fg_weight=float(fg_weight), bg_weight=float(bg_weight),
        depth_min=float(disc_cfg["depth_min"]), depth_max=float(disc_cfg["depth_max"]),
        num_bins=num_bins, mode=disc_cfg["mode"],
        num_boxes=N, height=int(H),
        ch_unroll=ch_unroll, box_unroll=box_unroll, padded_tail=padded_tail)

    bytes_in = (depth_logits.size * depth_logits.dtype.itemsize
                + depth_maps.size * depth_maps.dtype.itemsize
                + box_corners.size * 4)
    bytes_out = B * nH * 8 * 128 * 4
    cost = pl.CostEstimate(
        flops=int((16 * C + 2 * N + 40) * B * H * W),
        transcendentals=int((C + 3) * B * H * W),
        bytes_accessed=int(bytes_in + bytes_out))

    partials = pl.pallas_call(
        kernel,
        out_shape=jax.ShapeDtypeStruct((B, nH, 8, 128), jnp.float32),
        grid_spec=pltpu.PrefetchScalarGridSpec(
            num_scalar_prefetch=1,
            grid=(B, nH),
            in_specs=[
                pl.BlockSpec((None, C, tile_h, W), lambda b, t, boxes: (b, 0, t, 0)),
                pl.BlockSpec((None, tile_h, W), lambda b, t, boxes: (b, t, 0)),
            ],
            out_specs=pl.BlockSpec((None, None, 8, 128),
                                   lambda b, t, boxes: (b, t, 0, 0)),
            scratch_shapes=[pltpu.VMEM((C, tile_h, W), e_dtype)],
        ),
        compiler_params=pltpu.CompilerParams(
            dimension_semantics=("parallel", "parallel"),
            vmem_limit_bytes=int(vmem_limit)),
        cost_estimate=cost,
    )(box_corners, depth_logits, depth_maps)   # native dtypes; cast inside kernel

    num_pixels = jnp.float32(B * H * W)        # fg_mask.sum() + bg_mask.sum()
    fg_loss = jnp.sum(partials[:, :, 0, 0]) / num_pixels
    bg_loss = jnp.sum(partials[:, :, 0, 1]) / num_pixels
    balancer_loss = fg_loss + bg_loss
    loss = balancer_loss * jnp.float32(weight)

    tb_dict = {
        "balancer_loss": balancer_loss,
        "fg_loss": fg_loss,
        "bg_loss": bg_loss,
        "ddn_loss": loss,
    }
    # TODO(synk): PyTorch returns tb_dict entries via .item(); here they stay JAX scalars.
    return loss, tb_dict


if __name__ == "__main__":
    # Deterministic DDNLoss hyperparameters (synthetic, CaDDN-like values).
    weight = 3.0
    alpha = 0.25
    gamma = 2.0
    fg_weight = 13.0
    bg_weight = 1.0
    downsample_factor = 4
    disc_cfg = {"mode": "LID", "num_bins": 8, "depth_min": 2.0, "depth_max": 46.8}

    B, C, H, W = 2, disc_cfg["num_bins"] + 1, 32, 128
    N = 3  # boxes per sample

    key = jax.random.PRNGKey(0)
    k1, k2, k3, k4 = jax.random.split(key, 4)
    depth_logits = jax.random.normal(k1, (B, C, H, W), dtype=jnp.float32)
    depth_maps = jax.random.uniform(k2, (B, H, W), dtype=jnp.float32,
                                    minval=0.0, maxval=50.0)
    # 2D boxes in original-image coordinates (feature map * downsample_factor)
    xy_scale = jnp.array([W * downsample_factor - 48.0,
                          H * downsample_factor - 48.0], dtype=jnp.float32)
    xy1 = jax.random.uniform(k3, (B, N, 2), dtype=jnp.float32) * xy_scale
    wh = 8.0 + jax.random.uniform(k4, (B, N, 2), dtype=jnp.float32) * 32.0
    gt_boxes2d = jnp.concatenate([xy1, xy1 + wh], axis=-1)   # (B, N, 4)

    loss, tb_dict = ddn_loss(
        depth_logits, depth_maps, gt_boxes2d,
        weight=weight, alpha=alpha, gamma=gamma, disc_cfg=disc_cfg,
        fg_weight=fg_weight, bg_weight=bg_weight,
        downsample_factor=downsample_factor,
        tile_h=16)   # exercise the multi-tile spatial path (grid = (2, 2)) + bf16 scratch

    jax.block_until_ready(loss)
    _ = {k: float(v) for k, v in tb_dict.items()}  # materialize tb scalars
    print("KERNEL_OK")
</pallas_src>

<mosaic_0001>
module attributes {stable_mosaic.version = 11 : i64} {
  func.func @_ddn_loss_kernel(%arg0: i32, %arg1: i32, %arg2: memref<24xi32, #tpu.memory_space<smem>>, %arg3: memref<1x9x16x128xf32, #tpu.memory_space<vmem>>, %arg4: memref<1x16x128xf32, #tpu.memory_space<vmem>>, %arg5: memref<1x1x8x128xf32, #tpu.memory_space<vmem>>, %arg6: memref<9x16x128xbf16, #tpu.memory_space<vmem>>) attributes {dimension_semantics = [#tpu.dimension_semantics<parallel>, #tpu.dimension_semantics<parallel>], iteration_bounds = array<i64: 2, 2>, scalar_prefetch = 1 : i64, scratch_operands = 1 : i64, tpu.core_type = #tpu.core_type<tc>, window_params = [{transform_indices = @transform_0, window_bounds = array<i64: 1, 9, 16, 128>}, {transform_indices = @transform_1, window_bounds = array<i64: 1, 16, 128>}, {transform_indices = @transform_2, window_bounds = array<i64: 1, 1, 8, 128>}]} {
    %c0 = arith.constant 0 : index
    %c0_0 = arith.constant 0 : index
    %c0_1 = arith.constant 0 : index
    %0 = vector.load %arg4[%c0, %c0_0, %c0_1] : memref<1x16x128xf32, #tpu.memory_space<vmem>>, vector<1x16x128xf32>
    %1 = vector.shape_cast %0 : vector<1x16x128xf32> to vector<16x128xf32>
    %cst = arith.constant 2.000000e+00 : f32
    %2 = vector.broadcast %cst : f32 to vector<16x128xf32>
    %3 = arith.subf %1, %2 : vector<16x128xf32>
    %cst_2 = arith.constant 6.42857122 : f32
    %4 = vector.broadcast %cst_2 : f32 to vector<16x128xf32>
    %5 = arith.mulf %4, %3 : vector<16x128xf32>
    %cst_3 = arith.constant 1.000000e+00 : f32
    %6 = vector.broadcast %cst_3 : f32 to vector<16x128xf32>
    %7 = arith.addf %6, %5 : vector<16x128xf32>
    %8 = math.sqrt %7 : vector<16x128xf32>
    %cst_4 = arith.constant 5.000000e-01 : f32
    %9 = vector.broadcast %cst_4 : f32 to vector<16x128xf32>
    %10 = arith.mulf %9, %8 : vector<16x128xf32>
    %cst_5 = arith.constant -5.000000e-01 : f32
    %11 = vector.broadcast %cst_5 : f32 to vector<16x128xf32>
    %12 = arith.addf %11, %10 : vector<16x128xf32>
    %cst_6 = arith.constant 0.000000e+00 : f32
    %13 = vector.broadcast %cst_6 : f32 to vector<16x128xf32>
    %14 = arith.cmpf olt, %12, %13 : vector<16x128xf32>
    %cst_7 = arith.constant 8.000000e+00 : f32
    %15 = vector.broadcast %cst_7 : f32 to vector<16x128xf32>
    %16 = arith.cmpf ogt, %12, %15 : vector<16x128xf32>
    %17 = arith.ori %14, %16 : vector<16x128xi1>
    %18 = arith.cmpf one, %12, %12 : vector<16x128xf32>
    %19 = arith.ori %17, %18 : vector<16x128xi1>
    %20 = math.absf %12 : vector<16x128xf32>
    %cst_8 = arith.constant 0x7F800000 : f32
    %21 = vector.broadcast %cst_8 : f32 to vector<16x128xf32>
    %22 = arith.cmpf oeq, %20, %21 : vector<16x128xf32>
    %23 = arith.ori %19, %22 : vector<16x128xi1>
    %cst_9 = arith.constant 8.000000e+00 : f32
    %24 = vector.broadcast %cst_9 : f32 to vector<16x128xf32>
    %25 = arith.select %23, %24, %12 : vector<16x128xi1>, vector<16x128xf32>
    %26 = arith.fptosi %25 : vector<16x128xf32> to vector<16x128xi32>
    %cst_10 = arith.constant 0xFF800000 : f32
    %27 = vector.broadcast %cst_10 : f32 to vector<16x128xf32>
    %c0_i32 = arith.constant 0 : i32
    %c0_11 = arith.constant 0 : index
    %28 = arith.index_cast %c0_i32 : i32 to index
    %c0_12 = arith.constant 0 : index
    %c0_13 = arith.constant 0 : index
    %29 = vector.load %arg3[%c0_11, %28, %c0_12, %c0_13] : memref<1x9x16x128xf32, #tpu.memory_space<vmem>>, vector<1x1x16x128xf32>
    %30 = vector.shape_cast %29 : vector<1x1x16x128xf32> to vector<16x128xf32>
    %31 = arith.maximumf %27, %30 : vector<16x128xf32>
    %c1_i32 = arith.constant 1 : i32
    %c0_14 = arith.constant 0 : index
    %32 = arith.index_cast %c1_i32 : i32 to index
    %c0_15 = arith.constant 0 : index
    %c0_16 = arith.constant 0 : index
    %33 = vector.load %arg3[%c0_14, %32, %c0_15, %c0_16] : memref<1x9x16x128xf32, #tpu.memory_space<vmem>>, vector<1x1x16x128xf32>
    %34 = vector.shape_cast %33 : vector<1x1x16x128xf32> to vector<16x128xf32>
    %35 = arith.maximumf %31, %34 : vector<16x128xf32>
    %c2_i32 = arith.constant 2 : i32
    %c0_17 = arith.constant 0 : index
    %36 = arith.index_cast %c2_i32 : i32 to index
    %c0_18 = arith.constant 0 : index
    %c0_19 = arith.constant 0 : index
    %37 = vector.load %arg3[%c0_17, %36, %c0_18, %c0_19] : memref<1x9x16x128xf32, #tpu.memory_space<vmem>>, vector<1x1x16x128xf32>
    %38 = vector.shape_cast %37 : vector<1x1x16x128xf32> to vector<16x128xf32>
    %39 = arith.maximumf %35, %38 : vector<16x128xf32>
    %c3_i32 = arith.constant 3 : i32
    %c0_20 = arith.constant 0 : index
    %40 = arith.index_cast %c3_i32 : i32 to index
    %c0_21 = arith.constant 0 : index
    %c0_22 = arith.constant 0 : index
    %41 = vector.load %arg3[%c0_20, %40, %c0_21, %c0_22] : memref<1x9x16x128xf32, #tpu.memory_space<vmem>>, vector<1x1x16x128xf32>
    %42 = vector.shape_cast %41 : vector<1x1x16x128xf32> to vector<16x128xf32>
    %43 = arith.maximumf %39, %42 : vector<16x128xf32>
    %c4_i32 = arith.constant 4 : i32
    %c0_23 = arith.constant 0 : index
    %44 = arith.index_cast %c4_i32 : i32 to index
    %c0_24 = arith.constant 0 : index
    %c0_25 = arith.constant 0 : index
    %45 = vector.load %arg3[%c0_23, %44, %c0_24, %c0_25] : memref<1x9x16x128xf32, #tpu.memory_space<vmem>>, vector<1x1x16x128xf32>
    %46 = vector.shape_cast %45 : vector<1x1x16x128xf32> to vector<16x128xf32>
    %47 = arith.maximumf %43, %46 : vector<16x128xf32>
    %c5_i32 = arith.constant 5 : i32
    %c0_26 = arith.constant 0 : index
    %48 = arith.index_cast %c5_i32 : i32 to index
    %c0_27 = arith.constant 0 : index
    %c0_28 = arith.constant 0 : index
    %49 = vector.load %arg3[%c0_26, %48, %c0_27, %c0_28] : memref<1x9x16x128xf32, #tpu.memory_space<vmem>>, vector<1x1x16x128xf32>
    %50 = vector.shape_cast %49 : vector<1x1x16x128xf32> to vector<16x128xf32>
    %51 = arith.maximumf %47, %50 : vector<16x128xf32>
    %c6_i32 = arith.constant 6 : i32
    %c0_29 = arith.constant 0 : index
    %52 = arith.index_cast %c6_i32 : i32 to index
    %c0_30 = arith.constant 0 : index
    %c0_31 = arith.constant 0 : index
    %53 = vector.load %arg3[%c0_29, %52, %c0_30, %c0_31] : memref<1x9x16x128xf32, #tpu.memory_space<vmem>>, vector<1x1x16x128xf32>
    %54 = vector.shape_cast %53 : vector<1x1x16x128xf32> to vector<16x128xf32>
    %55 = arith.maximumf %51, %54 : vector<16x128xf32>
    %c7_i32 = arith.constant 7 : i32
    %c0_32 = arith.constant 0 : index
    %56 = arith.index_cast %c7_i32 : i32 to index
    %c0_33 = arith.constant 0 : index
    %c0_34 = arith.constant 0 : index
    %57 = vector.load %arg3[%c0_32, %56, %c0_33, %c0_34] : memref<1x9x16x128xf32, #tpu.memory_space<vmem>>, vector<1x1x16x128xf32>
    %58 = vector.shape_cast %57 : vector<1x1x16x128xf32> to vector<16x128xf32>
    %59 = arith.maximumf %55, %58 : vector<16x128xf32>
    %c8_i32 = arith.constant 8 : i32
    %c0_35 = arith.constant 0 : index
    %60 = arith.index_cast %c8_i32 : i32 to index
    %c0_36 = arith.constant 0 : index
    %c0_37 = arith.constant 0 : index
    %61 = vector.load %arg3[%c0_35, %60, %c0_36, %c0_37] : memref<1x9x16x128xf32, #tpu.memory_space<vmem>>, vector<1x1x16x128xf32>
    %62 = vector.shape_cast %61 : vector<1x1x16x128xf32> to vector<16x128xf32>
    %63 = arith.maximumf %59, %62 : vector<16x128xf32>
    %c9_i32 = arith.constant 9 : i32
    %cst_38 = arith.constant 0.000000e+00 : f32
    %64 = vector.broadcast %cst_38 : f32 to vector<16x128xf32>
    %c0_i32_39 = arith.constant 0 : i32
    %c0_40 = arith.constant 0 : index
    %65 = arith.index_cast %c0_i32_39 : i32 to index
    %c0_41 = arith.constant 0 : index
    %c0_42 = arith.constant 0 : index
    %66 = vector.load %arg3[%c0_40, %65, %c0_41, %c0_42] : memref<1x9x16x128xf32, #tpu.memory_space<vmem>>, vector<1x1x16x128xf32>
    %67 = vector.shape_cast %66 : vector<1x1x16x128xf32> to vector<16x128xf32>
    %68 = arith.subf %67, %63 : vector<16x128xf32>
    %69 = math.exp %68 : vector<16x128xf32>
    %70 = arith.truncf %69 : vector<16x128xf32> to vector<16x128xbf16>
    %71 = arith.index_cast %c0_i32_39 : i32 to index
    %c0_43 = arith.constant 0 : index
    %c0_44 = arith.constant 0 : index
    %72 = vector.load %arg6[%71, %c0_43, %c0_44] : memref<9x16x128xbf16, #tpu.memory_space<vmem>>, vector<1x16x128xbf16>
    %73 = vector.shape_cast %72 : vector<1x16x128xbf16> to vector<16x128xbf16>
    %74 = vector.shape_cast %70 : vector<16x128xbf16> to vector<1x16x128xbf16>
    tpu.vector_store %arg6[%71, %c0_43, %c0_44], %74 {strides = array<i32>} : memref<9x16x128xbf16, #tpu.memory_space<vmem>>, vector<1x16x128xbf16>,
    %75 = arith.addf %64, %69 : vector<16x128xf32>
    %c1_i32_45 = arith.constant 1 : i32
    %c0_46 = arith.constant 0 : index
    %76 = arith.index_cast %c1_i32_45 : i32 to index
    %c0_47 = arith.constant 0 : index
    %c0_48 = arith.constant 0 : index
    %77 = vector.load %arg3[%c0_46, %76, %c0_47, %c0_48] : memref<1x9x16x128xf32, #tpu.memory_space<vmem>>, vector<1x1x16x128xf32>
    %78 = vector.shape_cast %77 : vector<1x1x16x128xf32> to vector<16x128xf32>
    %79 = arith.subf %78, %63 : vector<16x128xf32>
    %80 = math.exp %79 : vector<16x128xf32>
    %81 = arith.truncf %80 : vector<16x128xf32> to vector<16x128xbf16>
    %82 = arith.index_cast %c1_i32_45 : i32 to index
    %c0_49 = arith.constant 0 : index
    %c0_50 = arith.constant 0 : index
    %83 = vector.load %arg6[%82, %c0_49, %c0_50] : memref<9x16x128xbf16, #tpu.memory_space<vmem>>, vector<1x16x128xbf16>
    %84 = vector.shape_cast %83 : vector<1x16x128xbf16> to vector<16x128xbf16>
    %85 = vector.shape_cast %81 : vector<16x128xbf16> to vector<1x16x128xbf16>
    tpu.vector_store %arg6[%82, %c0_49, %c0_50], %85 {strides = array<i32>} : memref<9x16x128xbf16, #tpu.memory_space<vmem>>, vector<1x16x128xbf16>,
    %86 = arith.addf %75, %80 : vector<16x128xf32>
    %c2_i32_51 = arith.constant 2 : i32
    %c0_52 = arith.constant 0 : index
    %87 = arith.index_cast %c2_i32_51 : i32 to index
    %c0_53 = arith.constant 0 : index
    %c0_54 = arith.constant 0 : index
    %88 = vector.load %arg3[%c0_52, %87, %c0_53, %c0_54] : memref<1x9x16x128xf32, #tpu.memory_space<vmem>>, vector<1x1x16x128xf32>
    %89 = vector.shape_cast %88 : vector<1x1x16x128xf32> to vector<16x128xf32>
    %90 = arith.subf %89, %63 : vector<16x128xf32>
    %91 = math.exp %90 : vector<16x128xf32>
    %92 = arith.truncf %91 : vector<16x128xf32> to vector<16x128xbf16>
    %93 = arith.index_cast %c2_i32_51 : i32 to index
    %c0_55 = arith.constant 0 : index
    %c0_56 = arith.constant 0 : index
    %94 = vector.load %arg6[%93, %c0_55, %c0_56] : memref<9x16x128xbf16, #tpu.memory_space<vmem>>, vector<1x16x128xbf16>
    %95 = vector.shape_cast %94 : vector<1x16x128xbf16> to vector<16x128xbf16>
    %96 = vector.shape_cast %92 : vector<16x128xbf16> to vector<1x16x128xbf16>
    tpu.vector_store %arg6[%93, %c0_55, %c0_56], %96 {strides = array<i32>} : memref<9x16x128xbf16, #tpu.memory_space<vmem>>, vector<1x16x128xbf16>,
    %97 = arith.addf %86, %91 : vector<16x128xf32>
    %c3_i32_57 = arith.constant 3 : i32
    %c0_58 = arith.constant 0 : index
    %98 = arith.index_cast %c3_i32_57 : i32 to index
    %c0_59 = arith.constant 0 : index
    %c0_60 = arith.constant 0 : index
    %99 = vector.load %arg3[%c0_58, %98, %c0_59, %c0_60] : memref<1x9x16x128xf32, #tpu.memory_space<vmem>>, vector<1x1x16x128xf32>
    %100 = vector.shape_cast %99 : vector<1x1x16x128xf32> to vector<16x128xf32>
    %101 = arith.subf %100, %63 : vector<16x128xf32>
    %102 = math.exp %101 : vector<16x128xf32>
    %103 = arith.truncf %102 : vector<16x128xf32> to vector<16x128xbf16>
    %104 = arith.index_cast %c3_i32_57 : i32 to index
    %c0_61 = arith.constant 0 : index
    %c0_62 = arith.constant 0 : index
    %105 = vector.load %arg6[%104, %c0_61, %c0_62] : memref<9x16x128xbf16, #tpu.memory_space<vmem>>, vector<1x16x128xbf16>
    %106 = vector.shape_cast %105 : vector<1x16x128xbf16> to vector<16x128xbf16>
    %107 = vector.shape_cast %103 : vector<16x128xbf16> to vector<1x16x128xbf16>
    tpu.vector_store %arg6[%104, %c0_61, %c0_62], %107 {strides = array<i32>} : memref<9x16x128xbf16, #tpu.memory_space<vmem>>, vector<1x16x128xbf16>,
    %108 = arith.addf %97, %102 : vector<16x128xf32>
    %c4_i32_63 = arith.constant 4 : i32
    %c0_64 = arith.constant 0 : index
    %109 = arith.index_cast %c4_i32_63 : i32 to index
    %c0_65 = arith.constant 0 : index
    %c0_66 = arith.constant 0 : index
    %110 = vector.load %arg3[%c0_64, %109, %c0_65, %c0_66] : memref<1x9x16x128xf32, #tpu.memory_space<vmem>>, vector<1x1x16x128xf32>
    %111 = vector.shape_cast %110 : vector<1x1x16x128xf32> to vector<16x128xf32>
    %112 = arith.subf %111, %63 : vector<16x128xf32>
    %113 = math.exp %112 : vector<16x128xf32>
    %114 = arith.truncf %113 : vector<16x128xf32> to vector<16x128xbf16>
    %115 = arith.index_cast %c4_i32_63 : i32 to index
    %c0_67 = arith.constant 0 : index
    %c0_68 = arith.constant 0 : index
    %116 = vector.load %arg6[%115, %c0_67, %c0_68] : memref<9x16x128xbf16, #tpu.memory_space<vmem>>, vector<1x16x128xbf16>
    %117 = vector.shape_cast %116 : vector<1x16x128xbf16> to vector<16x128xbf16>
    %118 = vector.shape_cast %114 : vector<16x128xbf16> to vector<1x16x128xbf16>
    tpu.vector_store %arg6[%115, %c0_67, %c0_68], %118 {strides = array<i32>} : memref<9x16x128xbf16, #tpu.memory_space<vmem>>, vector<1x16x128xbf16>,
    %119 = arith.addf %108, %113 : vector<16x128xf32>
    %c5_i32_69 = arith.constant 5 : i32
    %c0_70 = arith.constant 0 : index
    %120 = arith.index_cast %c5_i32_69 : i32 to index
    %c0_71 = arith.constant 0 : index
    %c0_72 = arith.constant 0 : index
    %121 = vector.load %arg3[%c0_70, %120, %c0_71, %c0_72] : memref<1x9x16x128xf32, #tpu.memory_space<vmem>>, vector<1x1x16x128xf32>
    %122 = vector.shape_cast %121 : vector<1x1x16x128xf32> to vector<16x128xf32>
    %123 = arith.subf %122, %63 : vector<16x128xf32>
    %124 = math.exp %123 : vector<16x128xf32>
    %125 = arith.truncf %124 : vector<16x128xf32> to vector<16x128xbf16>
    %126 = arith.index_cast %c5_i32_69 : i32 to index
    %c0_73 = arith.constant 0 : index
    %c0_74 = arith.constant 0 : index
    %127 = vector.load %arg6[%126, %c0_73, %c0_74] : memref<9x16x128xbf16, #tpu.memory_space<vmem>>, vector<1x16x128xbf16>
    %128 = vector.shape_cast %127 : vector<1x16x128xbf16> to vector<16x128xbf16>
    %129 = vector.shape_cast %125 : vector<16x128xbf16> to vector<1x16x128xbf16>
    tpu.vector_store %arg6[%126, %c0_73, %c0_74], %129 {strides = array<i32>} : memref<9x16x128xbf16, #tpu.memory_space<vmem>>, vector<1x16x128xbf16>,
    %130 = arith.addf %119, %124 : vector<16x128xf32>
    %c6_i32_75 = arith.constant 6 : i32
    %c0_76 = arith.constant 0 : index
    %131 = arith.index_cast %c6_i32_75 : i32 to index
    %c0_77 = arith.constant 0 : index
    %c0_78 = arith.constant 0 : index
    %132 = vector.load %arg3[%c0_76, %131, %c0_77, %c0_78] : memref<1x9x16x128xf32, #tpu.memory_space<vmem>>, vector<1x1x16x128xf32>
    %133 = vector.shape_cast %132 : vector<1x1x16x128xf32> to vector<16x128xf32>
    %134 = arith.subf %133, %63 : vector<16x128xf32>
    %135 = math.exp %134 : vector<16x128xf32>
    %136 = arith.truncf %135 : vector<16x128xf32> to vector<16x128xbf16>
    %137 = arith.index_cast %c6_i32_75 : i32 to index
    %c0_79 = arith.constant 0 : index
    %c0_80 = arith.constant 0 : index
    %138 = vector.load %arg6[%137, %c0_79, %c0_80] : memref<9x16x128xbf16, #tpu.memory_space<vmem>>, vector<1x16x128xbf16>
    %139 = vector.shape_cast %138 : vector<1x16x128xbf16> to vector<16x128xbf16>
    %140 = vector.shape_cast %136 : vector<16x128xbf16> to vector<1x16x128xbf16>
    tpu.vector_store %arg6[%137, %c0_79, %c0_80], %140 {strides = array<i32>} : memref<9x16x128xbf16, #tpu.memory_space<vmem>>, vector<1x16x128xbf16>,
    %141 = arith.addf %130, %135 : vector<16x128xf32>
    %c7_i32_81 = arith.constant 7 : i32
    %c0_82 = arith.constant 0 : index
    %142 = arith.index_cast %c7_i32_81 : i32 to index
    %c0_83 = arith.constant 0 : index
    %c0_84 = arith.constant 0 : index
    %143 = vector.load %arg3[%c0_82, %142, %c0_83, %c0_84] : memref<1x9x16x128xf32, #tpu.memory_space<vmem>>, vector<1x1x16x128xf32>
    %144 = vector.shape_cast %143 : vector<1x1x16x128xf32> to vector<16x128xf32>
    %145 = arith.subf %144, %63 : vector<16x128xf32>
    %146 = math.exp %145 : vector<16x128xf32>
    %147 = arith.truncf %146 : vector<16x128xf32> to vector<16x128xbf16>
    %148 = arith.index_cast %c7_i32_81 : i32 to index
    %c0_85 = arith.constant 0 : index
    %c0_86 = arith.constant 0 : index
    %149 = vector.load %arg6[%148, %c0_85, %c0_86] : memref<9x16x128xbf16, #tpu.memory_space<vmem>>, vector<1x16x128xbf16>
    %150 = vector.shape_cast %149 : vector<1x16x128xbf16> to vector<16x128xbf16>
    %151 = vector.shape_cast %147 : vector<16x128xbf16> to vector<1x16x128xbf16>
    tpu.vector_store %arg6[%148, %c0_85, %c0_86], %151 {strides = array<i32>} : memref<9x16x128xbf16, #tpu.memory_space<vmem>>, vector<1x16x128xbf16>,
    %152 = arith.addf %141, %146 : vector<16x128xf32>
    %c8_i32_87 = arith.constant 8 : i32
    %c0_88 = arith.constant 0 : index
    %153 = arith.index_cast %c8_i32_87 : i32 to index
    %c0_89 = arith.constant 0 : index
    %c0_90 = arith.constant 0 : index
    %154 = vector.load %arg3[%c0_88, %153, %c0_89, %c0_90] : memref<1x9x16x128xf32, #tpu.memory_space<vmem>>, vector<1x1x16x128xf32>
    %155 = vector.shape_cast %154 : vector<1x1x16x128xf32> to vector<16x128xf32>
    %156 = arith.subf %155, %63 : vector<16x128xf32>
    %157 = math.exp %156 : vector<16x128xf32>
    %158 = arith.truncf %157 : vector<16x128xf32> to vector<16x128xbf16>
    %159 = arith.index_cast %c8_i32_87 : i32 to index
    %c0_91 = arith.constant 0 : index
    %c0_92 = arith.constant 0 : index
    %160 = vector.load %arg6[%159, %c0_91, %c0_92] : memref<9x16x128xbf16, #tpu.memory_space<vmem>>, vector<1x16x128xbf16>
    %161 = vector.shape_cast %160 : vector<1x16x128xbf16> to vector<16x128xbf16>
    %162 = vector.shape_cast %158 : vector<16x128xbf16> to vector<1x16x128xbf16>
    tpu.vector_store %arg6[%159, %c0_91, %c0_92], %162 {strides = array<i32>} : memref<9x16x128xbf16, #tpu.memory_space<vmem>>, vector<1x16x128xbf16>,
    %163 = arith.addf %152, %157 : vector<16x128xf32>
    %c9_i32_93 = arith.constant 9 : i32
    %164 = math.log %163 : vector<16x128xf32>
    %165 = arith.addf %63, %164 : vector<16x128xf32>
    %166 = tpu.reciprocal %163 {approx = true} : vector<16x128xf32> -> vector<16x128xf32>
    %cst_94 = arith.constant 0.000000e+00 : f32
    %167 = vector.broadcast %cst_94 : f32 to vector<16x128xf32>
    %cst_95 = arith.constant -0.250000238 : f32
    %cst_96 = arith.constant -2.500000e-07 : f32
    %c0_i32_97 = arith.constant 0 : i32
    %c0_98 = arith.constant 0 : index
    %168 = arith.index_cast %c0_i32_97 : i32 to index
    %c0_99 = arith.constant 0 : index
    %c0_100 = arith.constant 0 : index
    %169 = vector.load %arg3[%c0_98, %168, %c0_99, %c0_100] : memref<1x9x16x128xf32, #tpu.memory_space<vmem>>, vector<1x1x16x128xf32>
    %170 = vector.shape_cast %169 : vector<1x1x16x128xf32> to vector<16x128xf32>
    %171 = arith.subf %170, %165 : vector<16x128xf32>
    %172 = arith.index_cast %c0_i32_97 : i32 to index
    %c0_101 = arith.constant 0 : index
    %c0_102 = arith.constant 0 : index
    %173 = vector.load %arg6[%172, %c0_101, %c0_102] : memref<9x16x128xbf16, #tpu.memory_space<vmem>>, vector<1x16x128xbf16>
    %174 = vector.shape_cast %173 : vector<1x16x128xbf16> to vector<16x128xbf16>
    %175 = arith.extf %174 : vector<16x128xbf16> to vector<16x128xf32>
    %176 = arith.mulf %175, %166 : vector<16x128xf32>
    %cst_103 = arith.constant 1.000000e+00 : f32
    %177 = vector.broadcast %cst_103 : f32 to vector<16x128xf32>
    %178 = arith.subf %177, %176 : vector<16x128xf32>
    %179 = arith.mulf %178, %178 : vector<16x128xf32>
    %180 = vector.broadcast %c0_i32_97 : i32 to vector<16x128xi32>
    %181 = arith.cmpi eq, %26, %180 : vector<16x128xi32>
    %182 = vector.broadcast %cst_95 : f32 to vector<16x128xf32>
    %183 = vector.broadcast %cst_96 : f32 to vector<16x128xf32>
    %184 = arith.select %181, %182, %183 : vector<16x128xi1>, vector<16x128xf32>
    %185 = arith.mulf %179, %171 : vector<16x128xf32>
    %186 = arith.mulf %184, %185 : vector<16x128xf32>
    %187 = arith.addf %167, %186 : vector<16x128xf32>
    %c1_i32_104 = arith.constant 1 : i32
    %c0_105 = arith.constant 0 : index
    %188 = arith.index_cast %c1_i32_104 : i32 to index
    %c0_106 = arith.constant 0 : index
    %c0_107 = arith.constant 0 : index
    %189 = vector.load %arg3[%c0_105, %188, %c0_106, %c0_107] : memref<1x9x16x128xf32, #tpu.memory_space<vmem>>, vector<1x1x16x128xf32>
    %190 = vector.shape_cast %189 : vector<1x1x16x128xf32> to vector<16x128xf32>
    %191 = arith.subf %190, %165 : vector<16x128xf32>
    %192 = arith.index_cast %c1_i32_104 : i32 to index
    %c0_108 = arith.constant 0 : index
    %c0_109 = arith.constant 0 : index
    %193 = vector.load %arg6[%192, %c0_108, %c0_109] : memref<9x16x128xbf16, #tpu.memory_space<vmem>>, vector<1x16x128xbf16>
    %194 = vector.shape_cast %193 : vector<1x16x128xbf16> to vector<16x128xbf16>
    %195 = arith.extf %194 : vector<16x128xbf16> to vector<16x128xf32>
    %196 = arith.mulf %195, %166 : vector<16x128xf32>
    %cst_110 = arith.constant 1.000000e+00 : f32
    %197 = vector.broadcast %cst_110 : f32 to vector<16x128xf32>
    %198 = arith.subf %197, %196 : vector<16x128xf32>
    %199 = arith.mulf %198, %198 : vector<16x128xf32>
    %200 = vector.broadcast %c1_i32_104 : i32 to vector<16x128xi32>
    %201 = arith.cmpi eq, %26, %200 : vector<16x128xi32>
    %202 = vector.broadcast %cst_95 : f32 to vector<16x128xf32>
    %203 = vector.broadcast %cst_96 : f32 to vector<16x128xf32>
    %204 = arith.select %201, %202, %203 : vector<16x128xi1>, vector<16x128xf32>
    %205 = arith.mulf %199, %191 : vector<16x128xf32>
    %206 = arith.mulf %204, %205 : vector<16x128xf32>
    %207 = arith.addf %187, %206 : vector<16x128xf32>
    %c2_i32_111 = arith.constant 2 : i32
    %c0_112 = arith.constant 0 : index
    %208 = arith.index_cast %c2_i32_111 : i32 to index
    %c0_113 = arith.constant 0 : index
    %c0_114 = arith.constant 0 : index
    %209 = vector.load %arg3[%c0_112, %208, %c0_113, %c0_114] : memref<1x9x16x128xf32, #tpu.memory_space<vmem>>, vector<1x1x16x128xf32>
    %210 = vector.shape_cast %209 : vector<1x1x16x128xf32> to vector<16x128xf32>
    %211 = arith.subf %210, %165 : vector<16x128xf32>
    %212 = arith.index_cast %c2_i32_111 : i32 to index
    %c0_115 = arith.constant 0 : index
    %c0_116 = arith.constant 0 : index
    %213 = vector.load %arg6[%212, %c0_115, %c0_116] : memref<9x16x128xbf16, #tpu.memory_space<vmem>>, vector<1x16x128xbf16>
    %214 = vector.shape_cast %213 : vector<1x16x128xbf16> to vector<16x128xbf16>
    %215 = arith.extf %214 : vector<16x128xbf16> to vector<16x128xf32>
    %216 = arith.mulf %215, %166 : vector<16x128xf32>
    %cst_117 = arith.constant 1.000000e+00 : f32
    %217 = vector.broadcast %cst_117 : f32 to vector<16x128xf32>
    %218 = arith.subf %217, %216 : vector<16x128xf32>
    %219 = arith.mulf %218, %218 : vector<16x128xf32>
    %220 = vector.broadcast %c2_i32_111 : i32 to vector<16x128xi32>
    %221 = arith.cmpi eq, %26, %220 : vector<16x128xi32>
    %222 = vector.broadcast %cst_95 : f32 to vector<16x128xf32>
    %223 = vector.broadcast %cst_96 : f32 to vector<16x128xf32>
    %224 = arith.select %221, %222, %223 : vector<16x128xi1>, vector<16x128xf32>
    %225 = arith.mulf %219, %211 : vector<16x128xf32>
    %226 = arith.mulf %224, %225 : vector<16x128xf32>
    %227 = arith.addf %207, %226 : vector<16x128xf32>
    %c3_i32_118 = arith.constant 3 : i32
    %c0_119 = arith.constant 0 : index
    %228 = arith.index_cast %c3_i32_118 : i32 to index
    %c0_120 = arith.constant 0 : index
    %c0_121 = arith.constant 0 : index
    %229 = vector.load %arg3[%c0_119, %228, %c0_120, %c0_121] : memref<1x9x16x128xf32, #tpu.memory_space<vmem>>, vector<1x1x16x128xf32>
    %230 = vector.shape_cast %229 : vector<1x1x16x128xf32> to vector<16x128xf32>
    %231 = arith.subf %230, %165 : vector<16x128xf32>
    %232 = arith.index_cast %c3_i32_118 : i32 to index
    %c0_122 = arith.constant 0 : index
    %c0_123 = arith.constant 0 : index
    %233 = vector.load %arg6[%232, %c0_122, %c0_123] : memref<9x16x128xbf16, #tpu.memory_space<vmem>>, vector<1x16x128xbf16>
    %234 = vector.shape_cast %233 : vector<1x16x128xbf16> to vector<16x128xbf16>
    %235 = arith.extf %234 : vector<16x128xbf16> to vector<16x128xf32>
    %236 = arith.mulf %235, %166 : vector<16x128xf32>
    %cst_124 = arith.constant 1.000000e+00 : f32
    %237 = vector.broadcast %cst_124 : f32 to vector<16x128xf32>
    %238 = arith.subf %237, %236 : vector<16x128xf32>
    %239 = arith.mulf %238, %238 : vector<16x128xf32>
    %240 = vector.broadcast %c3_i32_118 : i32 to vector<16x128xi32>
    %241 = arith.cmpi eq, %26, %240 : vector<16x128xi32>
    %242 = vector.broadcast %cst_95 : f32 to vector<16x128xf32>
    %243 = vector.broadcast %cst_96 : f32 to vector<16x128xf32>
    %244 = arith.select %241, %242, %243 : vector<16x128xi1>, vector<16x128xf32>
    %245 = arith.mulf %239, %231 : vector<16x128xf32>
    %246 = arith.mulf %244, %245 : vector<16x128xf32>
    %247 = arith.addf %227, %246 : vector<16x128xf32>
    %c4_i32_125 = arith.constant 4 : i32
    %c0_126 = arith.constant 0 : index
    %248 = arith.index_cast %c4_i32_125 : i32 to index
    %c0_127 = arith.constant 0 : index
    %c0_128 = arith.constant 0 : index
    %249 = vector.load %arg3[%c0_126, %248, %c0_127, %c0_128] : memref<1x9x16x128xf32, #tpu.memory_space<vmem>>, vector<1x1x16x128xf32>
    %250 = vector.shape_cast %249 : vector<1x1x16x128xf32> to vector<16x128xf32>
    %251 = arith.subf %250, %165 : vector<16x128xf32>
    %252 = arith.index_cast %c4_i32_125 : i32 to index
    %c0_129 = arith.constant 0 : index
    %c0_130 = arith.constant 0 : index
    %253 = vector.load %arg6[%252, %c0_129, %c0_130] : memref<9x16x128xbf16, #tpu.memory_space<vmem>>, vector<1x16x128xbf16>
    %254 = vector.shape_cast %253 : vector<1x16x128xbf16> to vector<16x128xbf16>
    %255 = arith.extf %254 : vector<16x128xbf16> to vector<16x128xf32>
    %256 = arith.mulf %255, %166 : vector<16x128xf32>
    %cst_131 = arith.constant 1.000000e+00 : f32
    %257 = vector.broadcast %cst_131 : f32 to vector<16x128xf32>
    %258 = arith.subf %257, %256 : vector<16x128xf32>
    %259 = arith.mulf %258, %258 : vector<16x128xf32>
    %260 = vector.broadcast %c4_i32_125 : i32 to vector<16x128xi32>
    %261 = arith.cmpi eq, %26, %260 : vector<16x128xi32>
    %262 = vector.broadcast %cst_95 : f32 to vector<16x128xf32>
    %263 = vector.broadcast %cst_96 : f32 to vector<16x128xf32>
    %264 = arith.select %261, %262, %263 : vector<16x128xi1>, vector<16x128xf32>
    %265 = arith.mulf %259, %251 : vector<16x128xf32>
    %266 = arith.mulf %264, %265 : vector<16x128xf32>
    %267 = arith.addf %247, %266 : vector<16x128xf32>
    %c5_i32_132 = arith.constant 5 : i32
    %c0_133 = arith.constant 0 : index
    %268 = arith.index_cast %c5_i32_132 : i32 to index
    %c0_134 = arith.constant 0 : index
    %c0_135 = arith.constant 0 : index
    %269 = vector.load %arg3[%c0_133, %268, %c0_134, %c0_135] : memref<1x9x16x128xf32, #tpu.memory_space<vmem>>, vector<1x1x16x128xf32>
    %270 = vector.shape_cast %269 : vector<1x1x16x128xf32> to vector<16x128xf32>
    %271 = arith.subf %270, %165 : vector<16x128xf32>
    %272 = arith.index_cast %c5_i32_132 : i32 to index
    %c0_136 = arith.constant 0 : index
    %c0_137 = arith.constant 0 : index
    %273 = vector.load %arg6[%272, %c0_136, %c0_137] : memref<9x16x128xbf16, #tpu.memory_space<vmem>>, vector<1x16x128xbf16>
    %274 = vector.shape_cast %273 : vector<1x16x128xbf16> to vector<16x128xbf16>
    %275 = arith.extf %274 : vector<16x128xbf16> to vector<16x128xf32>
    %276 = arith.mulf %275, %166 : vector<16x128xf32>
    %cst_138 = arith.constant 1.000000e+00 : f32
    %277 = vector.broadcast %cst_138 : f32 to vector<16x128xf32>
    %278 = arith.subf %277, %276 : vector<16x128xf32>
    %279 = arith.mulf %278, %278 : vector<16x128xf32>
    %280 = vector.broadcast %c5_i32_132 : i32 to vector<16x128xi32>
    %281 = arith.cmpi eq, %26, %280 : vector<16x128xi32>
    %282 = vector.broadcast %cst_95 : f32 to vector<16x128xf32>
    %283 = vector.broadcast %cst_96 : f32 to vector<16x128xf32>
    %284 = arith.select %281, %282, %283 : vector<16x128xi1>, vector<16x128xf32>
    %285 = arith.mulf %279, %271 : vector<16x128xf32>
    %286 = arith.mulf %284, %285 : vector<16x128xf32>
    %287 = arith.addf %267, %286 : vector<16x128xf32>
    %c6_i32_139 = arith.constant 6 : i32
    %c0_140 = arith.constant 0 : index
    %288 = arith.index_cast %c6_i32_139 : i32 to index
    %c0_141 = arith.constant 0 : index
    %c0_142 = arith.constant 0 : index
    %289 = vector.load %arg3[%c0_140, %288, %c0_141, %c0_142] : memref<1x9x16x128xf32, #tpu.memory_space<vmem>>, vector<1x1x16x128xf32>
    %290 = vector.shape_cast %289 : vector<1x1x16x128xf32> to vector<16x128xf32>
    %291 = arith.subf %290, %165 : vector<16x128xf32>
    %292 = arith.index_cast %c6_i32_139 : i32 to index
    %c0_143 = arith.constant 0 : index
    %c0_144 = arith.constant 0 : index
    %293 = vector.load %arg6[%292, %c0_143, %c0_144] : memref<9x16x128xbf16, #tpu.memory_space<vmem>>, vector<1x16x128xbf16>
    %294 = vector.shape_cast %293 : vector<1x16x128xbf16> to vector<16x128xbf16>
    %295 = arith.extf %294 : vector<16x128xbf16> to vector<16x128xf32>
    %296 = arith.mulf %295, %166 : vector<16x128xf32>
    %cst_145 = arith.constant 1.000000e+00 : f32
    %297 = vector.broadcast %cst_145 : f32 to vector<16x128xf32>
    %298 = arith.subf %297, %296 : vector<16x128xf32>
    %299 = arith.mulf %298, %298 : vector<16x128xf32>
    %300 = vector.broadcast %c6_i32_139 : i32 to vector<16x128xi32>
    %301 = arith.cmpi eq, %26, %300 : vector<16x128xi32>
    %302 = vector.broadcast %cst_95 : f32 to vector<16x128xf32>
    %303 = vector.broadcast %cst_96 : f32 to vector<16x128xf32>
    %304 = arith.select %301, %302, %303 : vector<16x128xi1>, vector<16x128xf32>
    %305 = arith.mulf %299, %291 : vector<16x128xf32>
    %306 = arith.mulf %304, %305 : vector<16x128xf32>
    %307 = arith.addf %287, %306 : vector<16x128xf32>
    %c7_i32_146 = arith.constant 7 : i32
    %c0_147 = arith.constant 0 : index
    %308 = arith.index_cast %c7_i32_146 : i32 to index
    %c0_148 = arith.constant 0 : index
    %c0_149 = arith.constant 0 : index
    %309 = vector.load %arg3[%c0_147, %308, %c0_148, %c0_149] : memref<1x9x16x128xf32, #tpu.memory_space<vmem>>, vector<1x1x16x128xf32>
    %310 = vector.shape_cast %309 : vector<1x1x16x128xf32> to vector<16x128xf32>
    %311 = arith.subf %310, %165 : vector<16x128xf32>
    %312 = arith.index_cast %c7_i32_146 : i32 to index
    %c0_150 = arith.constant 0 : index
    %c0_151 = arith.constant 0 : index
    %313 = vector.load %arg6[%312, %c0_150, %c0_151] : memref<9x16x128xbf16, #tpu.memory_space<vmem>>, vector<1x16x128xbf16>
    %314 = vector.shape_cast %313 : vector<1x16x128xbf16> to vector<16x128xbf16>
    %315 = arith.extf %314 : vector<16x128xbf16> to vector<16x128xf32>
    %316 = arith.mulf %315, %166 : vector<16x128xf32>
    %cst_152 = arith.constant 1.000000e+00 : f32
    %317 = vector.broadcast %cst_152 : f32 to vector<16x128xf32>
    %318 = arith.subf %317, %316 : vector<16x128xf32>
    %319 = arith.mulf %318, %318 : vector<16x128xf32>
    %320 = vector.broadcast %c7_i32_146 : i32 to vector<16x128xi32>
    %321 = arith.cmpi eq, %26, %320 : vector<16x128xi32>
    %322 = vector.broadcast %cst_95 : f32 to vector<16x128xf32>
    %323 = vector.broadcast %cst_96 : f32 to vector<16x128xf32>
    %324 = arith.select %321, %322, %323 : vector<16x128xi1>, vector<16x128xf32>
    %325 = arith.mulf %319, %311 : vector<16x128xf32>
    %326 = arith.mulf %324, %325 : vector<16x128xf32>
    %327 = arith.addf %307, %326 : vector<16x128xf32>
    %c8_i32_153 = arith.constant 8 : i32
    %c0_154 = arith.constant 0 : index
    %328 = arith.index_cast %c8_i32_153 : i32 to index
    %c0_155 = arith.constant 0 : index
    %c0_156 = arith.constant 0 : index
    %329 = vector.load %arg3[%c0_154, %328, %c0_155, %c0_156] : memref<1x9x16x128xf32, #tpu.memory_space<vmem>>, vector<1x1x16x128xf32>
    %330 = vector.shape_cast %329 : vector<1x1x16x128xf32> to vector<16x128xf32>
    %331 = arith.subf %330, %165 : vector<16x128xf32>
    %332 = arith.index_cast %c8_i32_153 : i32 to index
    %c0_157 = arith.constant 0 : index
    %c0_158 = arith.constant 0 : index
    %333 = vector.load %arg6[%332, %c0_157, %c0_158] : memref<9x16x128xbf16, #tpu.memory_space<vmem>>, vector<1x16x128xbf16>
    %334 = vector.shape_cast %333 : vector<1x16x128xbf16> to vector<16x128xbf16>
    %335 = arith.extf %334 : vector<16x128xbf16> to vector<16x128xf32>
    %336 = arith.mulf %335, %166 : vector<16x128xf32>
    %cst_159 = arith.constant 1.000000e+00 : f32
    %337 = vector.broadcast %cst_159 : f32 to vector<16x128xf32>
    %338 = arith.subf %337, %336 : vector<16x128xf32>
    %339 = arith.mulf %338, %338 : vector<16x128xf32>
    %340 = vector.broadcast %c8_i32_153 : i32 to vector<16x128xi32>
    %341 = arith.cmpi eq, %26, %340 : vector<16x128xi32>
    %342 = vector.broadcast %cst_95 : f32 to vector<16x128xf32>
    %343 = vector.broadcast %cst_96 : f32 to vector<16x128xf32>
    %344 = arith.select %341, %342, %343 : vector<16x128xi1>, vector<16x128xf32>
    %345 = arith.mulf %339, %331 : vector<16x128xf32>
    %346 = arith.mulf %344, %345 : vector<16x128xf32>
    %347 = arith.addf %327, %346 : vector<16x128xf32>
    %c9_i32_160 = arith.constant 9 : i32
    %c16_i32 = arith.constant 16 : i32
    %348 = arith.muli %arg1, %c16_i32 : i32
    %349 = tpu.iota {dimensions = array<i32: 0>} : vector<16x1xi32>
    %350 = vector.broadcast %348 : i32 to vector<16x1xi32>
    %351 = arith.addi %350, %349 : vector<16x1xi32>
    %352 = tpu.iota {dimensions = array<i32: 1>} : vector<1x128xi32>
    %cst_161 = arith.constant 0.000000e+00 : f32
    %353 = vector.broadcast %cst_161 : f32 to vector<16x128xf32>
    %c0_i32_162 = arith.constant 0 : i32
    %c3_i32_163 = arith.constant 3 : i32
    %354 = arith.muli %arg0, %c3_i32_163 : i32
    %355 = arith.addi %354, %c0_i32_162 : i32
    %c4_i32_164 = arith.constant 4 : i32
    %356 = arith.muli %355, %c4_i32_164 : i32
    %c0_i32_165 = arith.constant 0 : i32
    %357 = arith.addi %356, %c0_i32_165 : i32
    %358 = arith.index_cast %357 : i32 to index
    %359 = memref.load %arg2[%358] : memref<24xi32, #tpu.memory_space<smem>>
    %c1_i32_166 = arith.constant 1 : i32
    %360 = arith.addi %356, %c1_i32_166 : i32
    %361 = arith.index_cast %360 : i32 to index
    %362 = memref.load %arg2[%361] : memref<24xi32, #tpu.memory_space<smem>>
    %c2_i32_167 = arith.constant 2 : i32
    %363 = arith.addi %356, %c2_i32_167 : i32
    %364 = arith.index_cast %363 : i32 to index
    %365 = memref.load %arg2[%364] : memref<24xi32, #tpu.memory_space<smem>>
    %c3_i32_168 = arith.constant 3 : i32
    %366 = arith.addi %356, %c3_i32_168 : i32
    %367 = arith.index_cast %366 : i32 to index
    %368 = memref.load %arg2[%367] : memref<24xi32, #tpu.memory_space<smem>>
    %369 = vector.broadcast %362 : i32 to vector<16x1xi32>
    %370 = arith.cmpi sge, %351, %369 : vector<16x1xi32>
    %371 = vector.broadcast %368 : i32 to vector<16x1xi32>
    %372 = arith.cmpi slt, %351, %371 : vector<16x1xi32>
    %373 = arith.andi %370, %372 : vector<16x1xi1>
    %374 = arith.extui %373 : vector<16x1xi1> to vector<16x1xi32>
    %375 = arith.sitofp %374 : vector<16x1xi32> to vector<16x1xf32>
    %376 = vector.broadcast %359 : i32 to vector<1x128xi32>
    %377 = arith.cmpi sge, %352, %376 : vector<1x128xi32>
    %378 = vector.broadcast %365 : i32 to vector<1x128xi32>
    %379 = arith.cmpi slt, %352, %378 : vector<1x128xi32>
    %380 = arith.andi %377, %379 : vector<1x128xi1>
    %381 = arith.extui %380 : vector<1x128xi1> to vector<1x128xi32>
    %382 = arith.sitofp %381 : vector<1x128xi32> to vector<1x128xf32>
    %383 = vector.broadcast %375 : vector<16x1xf32> to vector<16x128xf32>
    %384 = vector.broadcast %382 : vector<1x128xf32> to vector<16x128xf32>
    %385 = arith.mulf %383, %384 : vector<16x128xf32>
    %386 = arith.maximumf %353, %385 : vector<16x128xf32>
    %c1_i32_169 = arith.constant 1 : i32
    %c3_i32_170 = arith.constant 3 : i32
    %387 = arith.muli %arg0, %c3_i32_170 : i32
    %388 = arith.addi %387, %c1_i32_169 : i32
    %c4_i32_171 = arith.constant 4 : i32
    %389 = arith.muli %388, %c4_i32_171 : i32
    %c0_i32_172 = arith.constant 0 : i32
    %390 = arith.addi %389, %c0_i32_172 : i32
    %391 = arith.index_cast %390 : i32 to index
    %392 = memref.load %arg2[%391] : memref<24xi32, #tpu.memory_space<smem>>
    %c1_i32_173 = arith.constant 1 : i32
    %393 = arith.addi %389, %c1_i32_173 : i32
    %394 = arith.index_cast %393 : i32 to index
    %395 = memref.load %arg2[%394] : memref<24xi32, #tpu.memory_space<smem>>
    %c2_i32_174 = arith.constant 2 : i32
    %396 = arith.addi %389, %c2_i32_174 : i32
    %397 = arith.index_cast %396 : i32 to index
    %398 = memref.load %arg2[%397] : memref<24xi32, #tpu.memory_space<smem>>
    %c3_i32_175 = arith.constant 3 : i32
    %399 = arith.addi %389, %c3_i32_175 : i32
    %400 = arith.index_cast %399 : i32 to index
    %401 = memref.load %arg2[%400] : memref<24xi32, #tpu.memory_space<smem>>
    %402 = vector.broadcast %395 : i32 to vector<16x1xi32>
    %403 = arith.cmpi sge, %351, %402 : vector<16x1xi32>
    %404 = vector.broadcast %401 : i32 to vector<16x1xi32>
    %405 = arith.cmpi slt, %351, %404 : vector<16x1xi32>
    %406 = arith.andi %403, %405 : vector<16x1xi1>
    %407 = arith.extui %406 : vector<16x1xi1> to vector<16x1xi32>
    %408 = arith.sitofp %407 : vector<16x1xi32> to vector<16x1xf32>
    %409 = vector.broadcast %392 : i32 to vector<1x128xi32>
    %410 = arith.cmpi sge, %352, %409 : vector<1x128xi32>
    %411 = vector.broadcast %398 : i32 to vector<1x128xi32>
    %412 = arith.cmpi slt, %352, %411 : vector<1x128xi32>
    %413 = arith.andi %410, %412 : vector<1x128xi1>
    %414 = arith.extui %413 : vector<1x128xi1> to vector<1x128xi32>
    %415 = arith.sitofp %414 : vector<1x128xi32> to vector<1x128xf32>
    %416 = vector.broadcast %408 : vector<16x1xf32> to vector<16x128xf32>
    %417 = vector.broadcast %415 : vector<1x128xf32> to vector<16x128xf32>
    %418 = arith.mulf %416, %417 : vector<16x128xf32>
    %419 = arith.maximumf %386, %418 : vector<16x128xf32>
    %c2_i32_176 = arith.constant 2 : i32
    %c3_i32_177 = arith.constant 3 : i32
    %420 = arith.muli %arg0, %c3_i32_177 : i32
    %421 = arith.addi %420, %c2_i32_176 : i32
    %c4_i32_178 = arith.constant 4 : i32
    %422 = arith.muli %421, %c4_i32_178 : i32
    %c0_i32_179 = arith.constant 0 : i32
    %423 = arith.addi %422, %c0_i32_179 : i32
    %424 = arith.index_cast %423 : i32 to index
    %425 = memref.load %arg2[%424] : memref<24xi32, #tpu.memory_space<smem>>
    %c1_i32_180 = arith.constant 1 : i32
    %426 = arith.addi %422, %c1_i32_180 : i32
    %427 = arith.index_cast %426 : i32 to index
    %428 = memref.load %arg2[%427] : memref<24xi32, #tpu.memory_space<smem>>
    %c2_i32_181 = arith.constant 2 : i32
    %429 = arith.addi %422, %c2_i32_181 : i32
    %430 = arith.index_cast %429 : i32 to index
    %431 = memref.load %arg2[%430] : memref<24xi32, #tpu.memory_space<smem>>
    %c3_i32_182 = arith.constant 3 : i32
    %432 = arith.addi %422, %c3_i32_182 : i32
    %433 = arith.index_cast %432 : i32 to index
    %434 = memref.load %arg2[%433] : memref<24xi32, #tpu.memory_space<smem>>
    %435 = vector.broadcast %428 : i32 to vector<16x1xi32>
    %436 = arith.cmpi sge, %351, %435 : vector<16x1xi32>
    %437 = vector.broadcast %434 : i32 to vector<16x1xi32>
    %438 = arith.cmpi slt, %351, %437 : vector<16x1xi32>
    %439 = arith.andi %436, %438 : vector<16x1xi1>
    %440 = arith.extui %439 : vector<16x1xi1> to vector<16x1xi32>
    %441 = arith.sitofp %440 : vector<16x1xi32> to vector<16x1xf32>
    %442 = vector.broadcast %425 : i32 to vector<1x128xi32>
    %443 = arith.cmpi sge, %352, %442 : vector<1x128xi32>
    %444 = vector.broadcast %431 : i32 to vector<1x128xi32>
    %445 = arith.cmpi slt, %352, %444 : vector<1x128xi32>
    %446 = arith.andi %443, %445 : vector<1x128xi1>
    %447 = arith.extui %446 : vector<1x128xi1> to vector<1x128xi32>
    %448 = arith.sitofp %447 : vector<1x128xi32> to vector<1x128xf32>
    %449 = vector.broadcast %441 : vector<16x1xf32> to vector<16x128xf32>
    %450 = vector.broadcast %448 : vector<1x128xf32> to vector<16x128xf32>
    %451 = arith.mulf %449, %450 : vector<16x128xf32>
    %452 = arith.maximumf %419, %451 : vector<16x128xf32>
    %c3_i32_183 = arith.constant 3 : i32
    %cst_184 = arith.constant 1.200000e+01 : f32
    %453 = vector.broadcast %cst_184 : f32 to vector<16x128xf32>
    %454 = arith.mulf %453, %452 : vector<16x128xf32>
    %cst_185 = arith.constant 1.000000e+00 : f32
    %455 = vector.broadcast %cst_185 : f32 to vector<16x128xf32>
    %456 = arith.addf %455, %454 : vector<16x128xf32>
    %457 = arith.mulf %347, %456 : vector<16x128xf32>
    %458 = arith.mulf %457, %452 : vector<16x128xf32>
    %459 = vector.shape_cast %458 : vector<16x128xf32> to vector<1x16x128xf32>
    %cst_186 = arith.constant dense<0.000000e+00> : vector<1xf32>
    %460 = vector.multi_reduction <add>, %459, %cst_186 [1, 2] : vector<1x16x128xf32> to vector<1xf32>
    %461 = vector.shape_cast %460 : vector<1xf32> to vector<1x1x1xf32>
    %462 = vector.extract %461[0, 0, 0] : f32 from vector<1x1x1xf32>
    %463 = vector.shape_cast %457 : vector<16x128xf32> to vector<1x16x128xf32>
    %cst_187 = arith.constant dense<0.000000e+00> : vector<1xf32>
    %464 = vector.multi_reduction <add>, %463, %cst_187 [1, 2] : vector<1x16x128xf32> to vector<1xf32>
    %465 = vector.shape_cast %464 : vector<1xf32> to vector<1x1x1xf32>
    %466 = vector.extract %465[0, 0, 0] : f32 from vector<1x1x1xf32>
    %467 = arith.subf %466, %462 : f32
    %468 = tpu.iota {dimensions = array<i32: 0>} : vector<8x128xi32>
    %469 = tpu.iota {dimensions = array<i32: 1>} : vector<8x128xi32>
    %c0_i32_188 = arith.constant 0 : i32
    %470 = vector.broadcast %c0_i32_188 : i32 to vector<8x128xi32>
    %471 = arith.cmpi eq, %468, %470 : vector<8x128xi32>
    %c0_i32_189 = arith.constant 0 : i32
    %472 = vector.broadcast %c0_i32_189 : i32 to vector<8x128xi32>
    %473 = arith.cmpi eq, %469, %472 : vector<8x128xi32>
    %474 = arith.andi %471, %473 : vector<8x128xi1>
    %c0_i32_190 = arith.constant 0 : i32
    %475 = vector.broadcast %c0_i32_190 : i32 to vector<8x128xi32>
    %476 = arith.cmpi eq, %468, %475 : vector<8x128xi32>
    %c1_i32_191 = arith.constant 1 : i32
    %477 = vector.broadcast %c1_i32_191 : i32 to vector<8x128xi32>
    %478 = arith.cmpi eq, %469, %477 : vector<8x128xi32>
    %479 = arith.andi %476, %478 : vector<8x128xi1>
    %cst_192 = arith.constant 0.000000e+00 : f32
    %480 = vector.broadcast %467 : f32 to vector<8x128xf32>
    %481 = vector.broadcast %cst_192 : f32 to vector<8x128xf32>
    %482 = arith.select %479, %480, %481 : vector<8x128xi1>, vector<8x128xf32>
    %483 = vector.broadcast %462 : f32 to vector<8x128xf32>
    %484 = arith.select %474, %483, %482 : vector<8x128xi1>, vector<8x128xf32>
    %c0_193 = arith.constant 0 : index
    %c0_194 = arith.constant 0 : index
    %c0_195 = arith.constant 0 : index
    %c0_196 = arith.constant 0 : index
    %485 = vector.load %arg5[%c0_193, %c0_194, %c0_195, %c0_196] : memref<1x1x8x128xf32, #tpu.memory_space<vmem>>, vector<1x1x8x128xf32>
    %486 = vector.shape_cast %485 : vector<1x1x8x128xf32> to vector<8x128xf32>
    %487 = vector.shape_cast %484 : vector<8x128xf32> to vector<1x1x8x128xf32>
    tpu.vector_store %arg5[%c0_193, %c0_194, %c0_195, %c0_196], %487 {strides = array<i32>} : memref<1x1x8x128xf32, #tpu.memory_space<vmem>>, vector<1x1x8x128xf32>,
    return
  }
  func.func @transform_0(%arg0: i32, %arg1: i32, %arg2: memref<24xi32, #tpu.memory_space<smem>>) -> (i32, i32, i32, i32) {
    %c0_i32 = arith.constant 0 : i32
    %c0_i32_0 = arith.constant 0 : i32
    %c0_i32_1 = arith.constant 0 : i32
    return %arg0, %c0_i32, %arg1, %c0_i32_0 : i32, i32, i32, i32
  }
  func.func @transform_1(%arg0: i32, %arg1: i32, %arg2: memref<24xi32, #tpu.memory_space<smem>>) -> (i32, i32, i32) {
    %c0_i32 = arith.constant 0 : i32
    %c0_i32_0 = arith.constant 0 : i32
    return %arg0, %arg1, %c0_i32 : i32, i32, i32
  }
  func.func @transform_2(%arg0: i32, %arg1: i32, %arg2: memref<24xi32, #tpu.memory_space<smem>>) -> (i32, i32, i32, i32) {
    %c0_i32 = arith.constant 0 : i32
    %c0_i32_0 = arith.constant 0 : i32
    %c0_i32_1 = arith.constant 0 : i32
    return %arg0, %arg1, %c0_i32, %c0_i32_0 : i32, i32, i32, i32
  }
}

</mosaic_0001>

<bundles_post_ra>
// kernel: tpu_custom_call.1
= control target key start
LH: loop header
LB: loop body
LE: loop exit
PB: predicated region body
PF: predicated region fallthrough
CT: control target
= control target key end

     0   :  { %s1465_s15 = smov [#allocation4]   ;;  %s2185_s0 = inlined_call_operand.hbm [shape: s32[24], index: 0, kind: input, shape index: {}]   ;;  %s2186_s1 = inlined_call_operand.hbm [shape: f32[2,9,32,128], index: 1, kind: input, shape index: {}]   ;;  %s2187_s2 = inlined_call_operand.hbm [shape: f32[2,32,128], index: 2, kind: input, shape index: {}]   ;;  %s2188_s3 = inlined_call_operand.hbm [shape: f32[2,2,8,128], index: 3, kind: output, shape index: {}]  }
   0x1   :  { %2193 = sst [smem:[#allocation21_spill]] %s2186_s1  ;;  %s9_s14 = sshll.u32 %s2185_s0, 4  ;;  %s10_s14 = int_to_ptr.hbm [resolvable:$true] %s9_s14 }
   0x2   :  { %12 = dma.hbm_to_smem %s10_s14, 16, %s1465_s15, [#allocation3] }
   0x3   :  { %1419 = dma.done.wait [#allocation3], 16 }
   0x4   :  { %1420 = vsyncadd [#allocation3], 4294967280 }
   0x5   :  { %15 = sfence }
   0x6   :  { %16 = vsyncpa [#allocation6], 0 }
   0x7   :  { %18 = vsyncpa [#allocation6 + $0x1], 0 }
   0x8   :  { %19 = vsyncpa [#allocation9], 0 }
   0x9   :  { %21 = vsyncpa [#allocation9 + $0x1], 0 }
   0xa   :  { %22 = vsyncpa [#allocation7], 0 }
   0xb   :  { %24 = vsyncpa [#allocation7 + $0x1], 0  ;;  %s1499_s16 = smov 0   ;;  %s1501_s17 = smov 0  }
   0xc   :  { %s1503_s18 = smov 0   ;;  %s1505_s19 = smov 0  }
   0xd   :  { %s1507_s0 = smov 0   ;;  %s1509_s20 = smov 0  }
   0xe   :  { %s1511_s21 = smov 0   ;;  %s1513_s22 = smov 0  }
   0xf LB: > { %s992_s23 = sadd.s32 4294967295, %s1463_s22   ;;  %s993_s24 = sadd.s32 4294967294, %s1463_s22   ;;  %s1463_s22 = sphi %s1513_s22, %s30_s22   ;;  %s1459_s21 = sphi %s1511_s21, %s2238_s21   ;;  %s1455_s20 = sphi %s1509_s20, %s2237_s20   ;;  %s1451_s0 = sphi %s1507_s0, %s2236_s0   ;;  %s1447_s19 = sphi %s1505_s19, %s2235_s19   ;;  %s1443_s18 = sphi %s1503_s18, %s2234_s18   ;;  %s1439_s17 = sphi %s1501_s17, %s2233_s17   ;;  %s1435_s16 = sphi %s1499_s16, %s2232_s16  }
  0x10   : > { %s39_s25 = sadd.s32 1, %s1455_s20  ;;  %s42_s26 = sadd.s32 1, %s1459_s21 }
  0x11   : > { %p40_p0 = scmp.ge.s32.totalorder %s39_s25, 2  ;;  %p58_p1 = scmp.ne.s32.totalorder %s1443_s18, %s1439_s17 }
  0x12   : > { %p59_p2 = scmp.eq.s32.totalorder %s1463_s22, 0  ;;  %p64_p5 = scmp.ne.s32.totalorder %s1439_s17, %s1435_s16 }
  0x13   : > { %s2240_s25 = smov (%p40_p0, %s39_s25), 0  ;;  %s2242_s26 = smov (!%p40_p0, %s42_s26), %s1459_s21 }
  0x14   : > { %2194 = sst [smem:[#allocation18_spill]] %s2240_s25  ;;  %s47_s27 = ssub.s32 %s1455_s20, %s2240_s25 }
  0x15   : > { %p1551_p3 = por %p59_p2, %p58_p1  ;;  %p44_p4 = scmp.ge.s32.totalorder %s2242_s26, 2 }
  0x16   : > { %p65_p6 = scmp.eq.s32.totalorder %s992_s23, 0  ;;  %p118_p7 = scmp.eq.s32.totalorder %s992_s23, 3 }
  0x17   : > { %s2244_s26 = smov (%p44_p4, %s2242_s26), 0  ;;  %p124_p10 = scmp.eq.s32.totalorder %s993_s24, 3 }
  0x18   : > { %2196 = sst [smem:[#allocation19_spill]] %s2244_s26  ;;  %p1559_p8 = por %p65_p6, %p64_p5 }
  0x19   : > { %p1563_p9 = por %p118_p7, %p58_p1  ;;  %s46_s4 = ssub.s32 %s1459_s21, %s2244_s26 }
  0x1a   : > { %s48_s5 = sor.u32 %s47_s27, %s46_s4  ;;  %s51_s6 = sadd.s32 1, %s1443_s18 }
  0x1b   : > { %p49_p11 = scmp.eq.s32.totalorder %s48_s5, 0  ;;  %p1570_p12 = por %p124_p10, %p64_p5 }
  0x1c   : > { %p995_p13 = scmp.ge.s32.totalorder %s1463_s22, 4 }
  0x1d   : > { %s1575_s8 = scalar_select %p49_p11, %s1443_s18, %s51_s6  }
  0x1e   : > { %140 = sbr.rel (%p995_p13) target bundleno = 57 (0x39), region = 16 }
  0x1f   : > { %2200 = sst [smem:[#allocation20_spill]] %s1575_s8 }
  0x23   : > { %s1579_s9 = sand.u32 1, %s1443_s18   ;;  %s996_s11 = sshll.u32 %s1455_s20, 1 }
  0x24   : > { %s1161_s10 = smul.u32 144, %s1579_s9  ;;  %s1466_s13 = smov 512  }
  0x25   : > { %s1162_s12 = smul.u32 36, %s1459_s21  ;;  %1179 = sst [smem:[#allocation12]] (%p1551_p3), %s1466_s13 }
  0x26   : > { %s2201_s1 = sld [smem:[#allocation21_spill]]  ;;  %s148_s5 = scalar_lea.vmem [#allocation5], %s1161_s10 }
  0x27   : > { %s153_s14 = sadd.s32 %s1162_s12, %s996_s11  ;;  %s170_s6 = sshll.u32 %s148_s5, 4  ;;  %s171_s6 = int_to_ptr.vmem [resolvable:$true] %s170_s6 }
  0x28   : > { %s997_s15 = sshll.u32 %s153_s14, 3  ;;  %s1467_s26 = smov 256  }
  0x29   : > { %s1178_s4 = scalar_select %p1551_p3, [#allocation0], [#allocation13] }
  0x2a   : > { %1180 = sst [smem:[#allocation12 + $0x1]] (%p1551_p3), %s1467_s26  ;;  %s1468_s8 = smov 2  }
  0x2b   : > { %s160_s25 = sld [smem:[%s1178_s4]]   ;;  %s1469_s12 = smov 128  }
  0x2c   : > { %s155_s27 = scalar_lea.hbm %s2201_s1, %s997_s15  ;;  %1181 = sst [smem:[#allocation12 + $0x2]] (%p1551_p3), %s1468_s8 }
  0x2d   : > { %s168_s13 = sshll.u32 %s155_s27, 4  ;;  %1182 = sst [smem:[#allocation12 + $0x3]] (%p1551_p3), %s1469_s12  ;;  %s169_s13 = int_to_ptr.hbm [resolvable:$true] %s168_s13 }
  0x2e   : > { %1183 = sst [smem:[#allocation12 + $0x4]] (%p1551_p3), %s1469_s12  ;;  %s1470_s14 = smov 8  }
  0x2f   : > { %1184 = sst [smem:[#allocation12 + $0x5]] (%p1551_p3), %s1470_s14  ;;  %s145_s23 = scalar_lea.sflag [#allocation6], %s1579_s9 }
  0x30   : > { %s1471_s26 = smov [#allocation11]   ;;  %s1000_s8 = sshll.u32 %s1579_s9, 4 }
  0x31   : > { %s998_s10 = sshll.u32 %s160_s25, 26  ;;  %s1002_s24 = sshll.u32 %s1459_s21, 2 }
  0x32   : > { %s999_s15 = sadd.s32 134217728, %s998_s10  ;;  %s202_s27 = sadd.s32 %s1002_s24, %s996_s11 }
  0x33   : > { %1185 = dma.general (%p1551_p3), %s169_s13, 2304, %s171_s6, %s145_s23, %s1471_s26, [#allocation12], %s999_s15, 0  }
  0x34   : > { %s197_s4 = scalar_lea.vmem [#allocation8], %s1000_s8  ;;  %s1003_s12 = sshll.u32 %s202_s27, 3 }
  0x35   : > { %s207_s5 = sshll.u32 %s197_s4, 4  ;;  %s204_s10 = scalar_lea.hbm %s2187_s2, %s1003_s12  ;;  %s208_s5 = int_to_ptr.vmem [resolvable:$true] %s207_s5 }
  0x36   : > { %s205_s1 = sshll.u32 %s204_s10, 4  ;;  %s194_s6 = scalar_lea.sflag [#allocation9], %s1579_s9  ;;  %s206_s1 = int_to_ptr.hbm [resolvable:$true] %s205_s1 }
  0x37   : > { %s1472_s13 = smov 128   ;;  %s1473_s15 = smov 8  }
  0x38   : > { %1186 = dma.hbm_to_vmem [thread:$0]  (%p1551_p3), %s206_s1, 256, %s208_s5, %s194_s6, %s1472_s13, %s1472_s13, %s1473_s15  }
  0x39 PF: > { %p1004_p0 = scmp.ge.s32.totalorder %s1463_s22, 1  ;;  %p215_p1 = scmp.lt.s32.totalorder %s1463_s22, 5 }
  0x3b   : > { %p216_p2 = pnand %p1004_p0, %p215_p1 }
  0x3c   : > { %s1619_s11 = sand.u32 (!%p216_p2), 1, %s1439_s17  }
  0x3d   : > { %219 = sbr.rel (%p216_p2) target bundleno = 389 (0x185), region = 28  ;;  %s222_s26 = scalar_lea.sflag (!%p216_p2), [#allocation6], %s1619_s11 }
  0x3e   : > { %s1163_s23 = smul.u32 (!%p216_p2), 144, %s1619_s11 }
  0x40   : > { %s1623_s9 = scalar_lea.vmem (!%p216_p2), [#allocation5], %s1163_s23 }
  0x42   : > { %1422 = dma.done.wait (%p1559_p8), %s222_s26, 2304  }
  0x43   : > { %1424 = vsyncadd (%p1559_p8), %s222_s26, 4294964992  ;;  %s1005_s1 = sshll.u32 %s1619_s11, 4  ;;  %s232_s28 = scalar_lea.sflag [#allocation9], %s1619_s11 }
  0x44   : > { %s235_s8 = scalar_lea.vmem [#allocation8], %s1005_s1 }
  0x45   : > { %1426 = dma.done.wait (%p1559_p8), %s232_s28, 256  }
  0x46   : > { %1428 = vsyncadd (%p1559_p8), %s232_s28, 4294967040  ;;  %v264_v0 = vld [vmem:[%s235_s8] sm:$0xff]  ;;  %v265_v1 = vld [vmem:[%s235_s8 + $0x8] sm:$0xff]  ;;  %s1987_s29 = smul.u32 12, %s1451_s0  ;;  %s1057_s27 = sshll.u32 %s1447_s19, 4 }
  0x47   : > { %v1636_v2 = vld [vmem:[%s1623_s9] sm:$0xff]  ;;  %v1007_v3 = vadd.f32 -2.0, %v264_v0  ;;  %v1008_v4 = vadd.f32 -2.0, %v265_v1  ;;  %v1639_v5 = vld [vmem:[%s1623_s9 + $0x8] sm:$0xff]  ;;  %v1642_v6 = vld [vmem:[%s1623_s9 + $0x10] sm:$0xff] }
  0x48   : > { %v1645_v7 = vld [vmem:[%s1623_s9 + $0x18] sm:$0xff]  ;;  %v325_v8 = vmax.f32 %v1636_v2, %v1642_v6  ;;  %v1652_v10 = vld [vmem:[%s1623_s9 + $0x20] sm:$0xff]  ;;  %v1655_v11 = vld [vmem:[%s1623_s9 + $0x28] sm:$0xff]  ;;  %s729_s24 = sadd.s32 1, %s1987_s29  ;;  %s733_s4 = sadd.s32 3, %s1987_s29 }
  0x49   : > { %v326_v9 = vmax.f32 %v1639_v5, %v1645_v7  ;;  %v268_v12 = vmul.f32 6.428571, %v1007_v3  ;;  %v269_v13 = vmul.f32 6.428571, %v1008_v4  ;;  %v1658_v14 = vld [vmem:[%s1623_s9 + $0x30] sm:$0xff]  ;;  %v1661_v15 = vld [vmem:[%s1623_s9 + $0x38] sm:$0xff] }
  0x4a   : > { %v330_v16 = vmax.f32 %v325_v8, %v1652_v10  ;;  %v1672_v22 = vld [vmem:[%s1623_s9 + $0x40] sm:$0xff]  ;;  %v1675_v23 = vld [vmem:[%s1623_s9 + $0x48] sm:$0xff]  ;;  %v1680_v24 = vld [vmem:[%s1623_s9 + $0x50] sm:$0xff]  ;;  %s2006_s5 = sld [smem:[#allocation4 + %s1987_s29]]  ;;  %s2009_s12 = sadd.s32 4, %s1987_s29 }
  0x4b   : > { %v331_v17 = vmax.f32 %v326_v9, %v1655_v11  ;;  %v1665_v18 = vadd.f32 1.0, %v268_v12  ;;  %v1667_v19 = vadd.f32 1.0, %v269_v13  ;;  %v1683_v25 = vld [vmem:[%s1623_s9 + $0x58] sm:$0xff]  ;;  %v1688_v28 = vld [vmem:[%s1623_s9 + $0x60] sm:$0xff]  ;;  %v1691_v29 = vld [vmem:[%s1623_s9 + $0x68] sm:$0xff]  ;;  %s2017_s14 = sld [smem:[#allocation4 + %s729_s24]] }
  0x4c   : > { %v335_v20 = vmax.f32 %v330_v16, %v1658_v14  ;;  %v1696_v32 = vld [vmem:[%s1623_s9 + $0x70] sm:$0xff]  ;;  %v1699_v33 = vld [vmem:[%s1623_s9 + $0x78] sm:$0xff]  ;;  %v1705_v39 = vld [vmem:[%s1623_s9 + $0x80] sm:$0xff]  ;;  %s731_s25 = sadd.s32 2, %s1987_s29  ;;  %s2022_s10 = sld [smem:[#allocation4 + %s733_s4]] }
  0x4d   : > { %v336_v21 = vmax.f32 %v331_v17, %v1661_v15  ;;  %1271 = vrsqrt.f32 %v1665_v18  ;;  %v1708_v40 = vld [vmem:[%s1623_s9 + $0x88] sm:$0xff]  ;;  %vm279_vm0 = vcmp.eq.f32.partialorder %v1665_v18, inf  ;;  %vm281_vm1 = vcmp.eq.f32.partialorder %v1665_v18, 0.0  ;;  %s762_s6 = sadd.s32 1, %s2009_s12  ;;  %s2027_s13 = sadd.s32 8, %s1987_s29 }
  0x4e   : > { %1273 = vrsqrt.f32 %v1667_v19  ;;  %v340_v26 = vmax.f32 %v335_v20, %v1672_v22  ;;  %v282_v49 = vand.u32 2147483648, %v1665_v18  ;;  %vm291_vm2 = vcmp.eq.f32.partialorder %v1667_v19, inf  ;;  %s2035_s15 = sld [smem:[#allocation4 + %s731_s25]]  ;;  %s764_s23 = sadd.s32 2, %s2009_s12 }
  0x4f   : > { %v341_v27 = vmax.f32 %v336_v21, %v1675_v23  ;;  %vm293_vm3 = vcmp.eq.f32.partialorder %v1667_v19, 0.0  ;;  %v294_v63 = vand.u32 2147483648, %v1667_v19  ;;  %s2041_s26 = sld [smem:[#allocation4 + %s2009_s12]]  ;;  %s766_s9 = sadd.s32 3, %s2009_s12 }
  0x50   : > { %v345_v30 = vmax.f32 %v340_v26, %v1680_v24  ;;  %s2048_s1 = sld [smem:[#allocation4 + %s762_s6]]  ;;  %s794_s28 = sadd.s32 1, %s2027_s13 }
  0x51   : > { %v346_v31 = vmax.f32 %v341_v27, %v1683_v25  ;;  %s2057_s8 = sld [smem:[#allocation4 + %s764_s23]]  ;;  %s798_s29 = sadd.s32 3, %s2027_s13 }
  0x52   : > { %v350_v35 = vmax.f32 %v345_v30, %v1688_v28  ;;  %s2065_s24 = sld [smem:[#allocation4 + %s766_s9]]  ;;  %s796_s4 = sadd.s32 2, %s2027_s13 }
  0x53   : > { %v1272_v34 = vpop.eup %1271  ;;  %v351_v36 = vmax.f32 %v346_v31, %v1691_v29  ;;  %s2078_s12 = sld [smem:[#allocation4 + %s798_s29]]  ;;  %s1006_s6 = sshll.u32 %s1619_s11, 3 }
  0x54   : > { %v1274_v37 = vpop.eup %1273  ;;  %v273_v38 = vmul.f32 %v1272_v34, %v1665_v18  ;;  %v355_v42 = vmax.f32 %v350_v35, %v1696_v32  ;;  %s2099_s25 = sld [smem:[#allocation4 + %s796_s4]] }
  0x55   : > { %v285_v41 = vmul.f32 %v1274_v37, %v1667_v19  ;;  %v356_v43 = vmax.f32 %v351_v36, %v1699_v33 }
  0x56   : > { %v274_v44 = vmul.f32 %v1272_v34, %v273_v38  ;;  %v1716_v46 = vmax.f32 %v355_v42, %v1705_v39 }
  0x57   : > { %v286_v45 = vmul.f32 %v1274_v37, %v285_v41  ;;  %v1719_v47 = vmax.f32 %v356_v43, %v1708_v40 }
  0x58   : > { %v275_v48 = vmul.f32 0.5, %v274_v44  ;;  %v362_v51 = vsub.f32 %v1636_v2, %v1716_v46  ;;  %v376_v53 = vsub.f32 %v1642_v6, %v1716_v46  ;;  %v391_v56 = vsub.f32 %v1652_v10, %v1716_v46 }
  0x59   : > { %v287_v50 = vmul.f32 0.5, %v286_v45  ;;  %v363_v52 = vsub.f32 %v1639_v5, %v1719_v47  ;;  %v377_v55 = vsub.f32 %v1645_v7, %v1719_v47  ;;  %v392_v57 = vsub.f32 %v1655_v11, %v1719_v47 }
  0x5a   : > { %v276_v54 = vsub.f32 1.5, %v275_v48  ;;  %v364_v59 = vmul.f32 1.442695, %v362_v51  ;;  %v406_v61 = vsub.f32 %v1658_v14, %v1716_v46  ;;  %v378_v0 = vmul.f32 1.442695, %v376_v53 }
  0x5b   : > { %v288_v58 = vsub.f32 1.5, %v287_v50  ;;  %v366_v60 = vmul.f32 1.442695, %v363_v52  ;;  %v380_v1 = vmul.f32 1.442695, %v377_v55  ;;  %v407_v8 = vsub.f32 %v1661_v15, %v1719_v47 }
  0x5c   : > { %v277_v62 = vmul.f32 %v1272_v34, %v276_v54  ;;  %1275 = vpow2.f32 %v364_v59  ;;  %v393_v4 = vmul.f32 1.442695, %v391_v56  ;;  %v395_v12 = vmul.f32 1.442695, %v392_v57 }
  0x5d   : > { %v289_v3 = vmul.f32 %v1274_v37, %v288_v58  ;;  %1277 = vpow2.f32 %v366_v60  ;;  %v421_v13 = vsub.f32 %v1672_v22, %v1716_v46  ;;  %v408_v17 = vmul.f32 1.442695, %v406_v61 }
  0x5e   : > { %v278_v9 = vmul.f32 %v277_v62, %v1665_v18  ;;  %1279 = vpow2.f32 %v378_v0  ;;  %v422_v20 = vsub.f32 %v1675_v23, %v1719_v47  ;;  %v410_v26 = vmul.f32 1.442695, %v407_v8 }
  0x5f   : > { %v290_v16 = vmul.f32 %v289_v3, %v1667_v19  ;;  %1281 = vpow2.f32 %v380_v1  ;;  %v436_v27 = vsub.f32 %v1680_v24, %v1716_v46  ;;  %v423_v34 = vmul.f32 1.442695, %v421_v13 }
  0x60   : > { %v280_v21 = vsel %vm279_vm0, %v1665_v18, %v278_v9  ;;  %1283 = vpow2.f32 %v393_v4  ;;  %v437_v37 = vsub.f32 %v1683_v25, %v1719_v47  ;;  %v425_v18 = vmul.f32 1.442695, %v422_v20 }
  0x61   : > { %v283_v30 = vsel %vm281_vm1, %v282_v49, %v280_v21  ;;  %v292_v31 = vsel %vm291_vm2, %v1667_v19, %v290_v16  ;;  %1285 = vpow2.f32 %v395_v12  ;;  %v438_v44 = vmul.f32 1.442695, %v436_v27 }
  0x62   : > { %v295_v35 = vsel %vm293_vm3, %v294_v63, %v292_v31  ;;  %v296_v36 = vmul.f32 0.5, %v283_v30  ;;  %v1761_v38 = vpop.eup %1275  ;;  %1287 = vpow2.f32 %v408_v17  ;;  %v451_v45 = vsub.f32 %v1688_v28, %v1716_v46 }
  0x63   : > { %v297_v41 = vmul.f32 0.5, %v295_v35  ;;  %v1763_v42 = vpop.eup %1277  ;;  %1289 = vpow2.f32 %v410_v26  ;;  %v440_v49 = vmul.f32 1.442695, %v437_v37  ;;  %v452_v50 = vsub.f32 %v1691_v29, %v1719_v47 }
  0x64   : > { %v298_v43 = vadd.f32 -0.5, %v296_v36  ;;  %v1767_v19 = vpop.eup %1279  ;;  %1291 = vpow2.f32 %v423_v34  ;;  %v453_v59 = vmul.f32 1.442695, %v451_v45  ;;  %v466_v9 = vsub.f32 %v1696_v32, %v1716_v46 }
  0x65   : > { %v299_v48 = vadd.f32 -0.5, %v297_v41  ;;  %v1771_v51 = vpop.eup %1281  ;;  %v387_v57 = vadd.f32 %v1767_v19, %v1761_v38  ;;  %1293 = vpow2.f32 %v425_v18  ;;  %v455_v4 = vmul.f32 1.442695, %v452_v50 }
  0x66   : > { %vm300_vm4 = vcmp.lt.f32.partialorder %v298_v43, 0.0  ;;  %vm302_vm5 = vcmp.gt.f32.partialorder %v298_v43, 8.0  ;;  %vm306_vm6 = vcmp.ne.f32.partialorder %v298_v43, %v298_v43  ;;  %v310_v52 = vand.u32 2147483647, %v298_v43  ;;  %v1773_v53 = vpop.eup %1283 }
  0x67   : > { %vm301_vm7 = vcmp.lt.f32.partialorder %v299_v48, 0.0  ;;  %vm303_vm8 = vcmp.gt.f32.partialorder %v299_v48, 8.0  ;;  %vm304_vm9 = vmor %vm300_vm4, %vm302_vm5  ;;  %vm307_vm10 = vcmp.ne.f32.partialorder %v299_v48, %v299_v48  ;;  %v311_v54 = vand.u32 2147483647, %v299_v48  ;;  %v1775_v55 = vpop.eup %1285 }
  0x68   : > { %vm305_vm11 = vmor %vm301_vm7, %vm303_vm8  ;;  %vm1777_vm12 = vcmp.eq.f32.partialorder %v310_v52, inf  ;;  %v388_v58 = vadd.f32 %v1771_v51, %v1763_v42  ;;  %v1288_v60 = vpop.eup %1287  ;;  %v402_v1 = vadd.f32 %v1773_v53, %v387_v57  ;;  %1295 = vpow2.f32 %v438_v44 }
  0x69   : > { %vm1786_vm13 = vmor %vm304_vm9, %vm306_vm6  ;;  %vm1790_vm14 = vcmp.eq.f32.partialorder %v311_v54, inf  ;;  %v1290_v63 = vpop.eup %1289  ;;  %1297 = vpow2.f32 %v440_v49  ;;  %v467_v12 = vsub.f32 %v1699_v33, %v1719_v47  ;;  %v481_v13 = vsub.f32 %v1705_v39, %v1716_v46 }
  0x6a   : > { %vm1794_vm15 = vmor %vm305_vm11, %vm307_vm10  ;;  %v403_v3 = vadd.f32 %v1775_v55, %v388_v58  ;;  %v1292_v8 = vpop.eup %1291  ;;  %v417_v17 = vadd.f32 %v1288_v60, %v402_v1  ;;  %1299 = vpow2.f32 %v453_v59  ;;  %v468_v37 = vmul.f32 1.442695, %v466_v9 }
  0x6b   : > { %vm314_vm0 = vmor %vm1786_vm13, %vm1777_vm12  ;;  %v1294_v35 = vpop.eup %1293  ;;  %1301 = vpow2.f32 %v455_v4  ;;  %v470_v41 = vmul.f32 1.442695, %v467_v12  ;;  %v483_v57 = vmul.f32 1.442695, %v481_v13  ;;  %v1822_v59 = vpack.c.bf16 %v1763_v42, %v1761_v38 }
  0x6c   : > { %vm315_vm1 = vmor %vm1794_vm15, %vm1790_vm14  ;;  %v316_v16 = vsel %vm314_vm0, 8.0, %v298_v43  ;;  %v418_v20 = vadd.f32 %v1290_v63, %v403_v3  ;;  %v432_v34 = vadd.f32 %v1292_v8, %v417_v17  ;;  %1303 = vpow2.f32 %v468_v37 }
  0x6d   : > { %v317_v21 = vsel %vm315_vm1, 8.0, %v299_v48  ;;  %vm1164_vm2 = vcmp.lt.s32.totalorder %v316_v16, 0  ;;  %v1165_v26 = vceil.f32 %v316_v16  ;;  %v1166_v27 = vfloor.f32 %v316_v16 }
  0x6e   : > { %vm1169_vm3 = vcmp.lt.s32.totalorder %v317_v21, 0  ;;  %v1170_v30 = vceil.f32 %v317_v21  ;;  %v1171_v31 = vfloor.f32 %v317_v21  ;;  %v1296_v18 = vpop.eup %1295  ;;  %v433_v45 = vadd.f32 %v1294_v35, %v418_v20 }
  0x6f   : > { %v1167_v36 = vsel %vm1164_vm2, %v1165_v26, %v1166_v27  ;;  %v1298_v43 = vpop.eup %1297  ;;  %v447_v50 = vadd.f32 %v1296_v18, %v432_v34  ;;  %v482_v48 = vsub.f32 %v1708_v40, %v1719_v47  ;;  %1305 = vpow2.f32 %v470_v41 }
  0x70   : > { %v1172_v44 = vsel %vm1169_vm3, %v1170_v30, %v1171_v31  ;;  %v1814_v49 = vcvt.f32.s32 %v1167_v36  ;;  %v1300_v52 = vpop.eup %1299  ;;  %v448_v56 = vadd.f32 %v1298_v43, %v433_v45  ;;  %1307 = vpow2.f32 %v483_v57 }
  0x71   : > { %v1818_v54 = vcvt.f32.s32 %v1172_v44  ;;  %v485_v58 = vmul.f32 1.442695, %v482_v48  ;;  %v462_v61 = vadd.f32 %v1300_v52, %v447_v50  ;;  %v1302_v62 = vpop.eup %1301  ;;  %v1826_v0 = vpack.c.bf16 %v1771_v51, %v1767_v19 }
  0x72   : > { %v463_v1 = vadd.f32 %v1302_v62, %v448_v56  ;;  %vm516_vm4 = vcmp.eq.s32.totalorder %v1814_v49, 0  ;;  %v1304_v3 = vpop.eup %1303  ;;  %v1832_v4 = vpack.c.bf16 %v1775_v55, %v1773_v53  ;;  %v1834_v38 = vpack.c.bf16 %v1290_v63, %v1288_v60 }
  0x73   : > { %1309 = vpow2.f32 %v485_v58  ;;  %vm517_vm5 = vcmp.eq.s32.totalorder %v1818_v54, 0  ;;  %v1836_v42 = vpack.c.bf16 %v1294_v35, %v1292_v8  ;;  %v1838_v12 = vpack.c.bf16 %v1298_v43, %v1296_v18 }
  0x74   : > { %v477_v19 = vadd.f32 %v1304_v3, %v462_v61  ;;  %v1125_v51 = vunpack.c.l.bf16 %v1822_v59  ;;  %vm540_vm6 = vcmp.eq.s32.totalorder %v1814_v49, 1  ;;  %v1126_v16 = vunpack.c.h.bf16 %v1822_v59 }
  0x75   : > { %v1306_v9 = vpop.eup %1305  ;;  %v2191_v17 = vmov -2.5e-07   ;;  %v1849_v60 = vpack.c.bf16 %v1302_v62, %v1300_v52  ;;  %v1129_v63 = vunpack.c.l.bf16 %v1826_v0  ;;  %v1130_v8 = vunpack.c.h.bf16 %v1826_v0 }
  0x76   : > { %v478_v13 = vadd.f32 %v1306_v9, %v463_v1  ;;  %v1844_v20 = vsel %vm516_vm4, -0.25000024, %v2191_v17  ;;  %v1847_v53 = vsel %vm517_vm5, -0.25000024, %v2191_v17  ;;  %v1308_v55 = vpop.eup %1307  ;;  %vm541_vm7 = vcmp.eq.s32.totalorder %v1818_v54, 1 }
  0x77   : > { %v492_v26 = vadd.f32 %v1308_v55, %v477_v19  ;;  %v1855_v27 = vsel %vm540_vm6, -0.25000024, %v2191_v17  ;;  %vm564_vm8 = vcmp.eq.s32.totalorder %v1814_v49, 2  ;;  %vm565_vm9 = vcmp.eq.s32.totalorder %v1818_v54, 2 }
  0x78   : > { %v1133_v31 = vunpack.c.l.bf16 %v1832_v4  ;;  %v1134_v34 = vunpack.c.h.bf16 %v1832_v4  ;;  %vm588_vm10 = vcmp.eq.s32.totalorder %v1814_v49, 3  ;;  %v1862_v35 = vpack.c.bf16 %v1306_v9, %v1304_v3 }
  0x79   : > { %v1310_v21 = vpop.eup %1309  ;;  %1311 = vlog2.f32 %v492_v26  ;;  %v1865_v36 = vsel %vm541_vm7, -0.25000024, %v2191_v17  ;;  %vm589_vm11 = vcmp.eq.s32.totalorder %v1818_v54, 3  ;;  %v1869_v37 = vsel %vm564_vm8, -0.25000024, %v2191_v17 }
  0x7a   : > { %v493_v30 = vadd.f32 %v1310_v21, %v478_v13  ;;  %v1872_v41 = vsel %vm565_vm9, -0.25000024, %v2191_v17  ;;  %v1877_v45 = vsel %vm588_vm10, -0.25000024, %v2191_v17  ;;  %vm612_vm12 = vcmp.eq.s32.totalorder %v1814_v49, 4 }
  0x7b   : > { %v1881_v43 = vsel %vm589_vm11, -0.25000024, %v2191_v17  ;;  %vm613_vm13 = vcmp.eq.s32.totalorder %v1818_v54, 4  ;;  %vm636_vm14 = vcmp.eq.s32.totalorder %v1814_v49, 5  ;;  %v1885_v50 = vpack.c.bf16 %v1310_v21, %v1308_v55 }
  0x7c   : > { %1313 = vlog2.f32 %v493_v30  ;;  %vm637_vm15 = vcmp.eq.s32.totalorder %v1818_v54, 5  ;;  %vm660_vm0 = vcmp.eq.s32.totalorder %v1814_v49, 6  ;;  %v1892_v56 = vsel %vm612_vm12, -0.25000024, %v2191_v17 }
  0x7d   : > { %1315 = vrcp.f32 %v492_v26  ;;  %vm661_vm1 = vcmp.eq.s32.totalorder %v1818_v54, 6  ;;  %v1897_v61 = vsel %vm613_vm13, -0.25000024, %v2191_v17  ;;  %v1901_v0 = vsel %vm636_vm14, -0.25000024, %v2191_v17 }
  0x7e   : > { %1317 = vrcp.f32 %v493_v30  ;;  %v1905_v9 = vsel %vm637_vm15, -0.25000024, %v2191_v17  ;;  %v1909_v13 = vsel %vm660_vm0, -0.25000024, %v2191_v17  ;;  %v1914_v26 = vsel %vm661_vm1, -0.25000024, %v2191_v17 }
  0x7f   : > { %v1312_v58 = vpop.eup %1311  ;;  %vm684_vm2 = vcmp.eq.s32.totalorder %v1814_v49, 7  ;;  %vm685_vm3 = vcmp.eq.s32.totalorder %v1818_v54, 7  ;;  %vm708_vm4 = vcmp.eq.s32.totalorder %v1814_v49, 8  ;;  %vm709_vm5 = vcmp.eq.s32.totalorder %v1818_v54, 8 }
  0x80   : > { %v495_v4 = vmul.f32 0.6931472, %v1312_v58  ;;  %v747_v49 = vstv %s2006_s5  ;;  %s1070_s5 = sshll.u32 %s1451_s0, 1  ;;  %s863_s0 = scalar_lea.sflag [#allocation7], %s1619_s11 }
  0x82   : > { %v1314_v3 = vpop.eup %1313  ;;  %v1921_v58 = vadd.f32 %v495_v4, %v1716_v46 }
  0x83   : > { %v1911_v55 = vpop.eup %1315  ;;  %v497_v21 = vmul.f32 0.6931472, %v1314_v3 }
  0x84   : > { %v1918_v62 = vpop.eup %1317  ;;  %v510_v19 = vmul.f32 %v1911_v55, %v1125_v51  ;;  %v534_v57 = vmul.f32 %v1911_v55, %v1129_v63  ;;  %v558_v52 = vmul.f32 %v1911_v55, %v1133_v31  ;;  %v504_v46 = vsub.f32 %v1636_v2, %v1921_v58 }
  0x85   : > { %v1927_v3 = vadd.f32 %v497_v21, %v1719_v47  ;;  %v511_v17 = vmul.f32 %v1918_v62, %v1126_v16  ;;  %v535_v1 = vmul.f32 %v1918_v62, %v1130_v8  ;;  %v559_v30 = vmul.f32 %v1918_v62, %v1134_v34 }
  0x86   : > { %v512_v4 = vsub.f32 1.0, %v510_v19  ;;  %v528_v51 = vsub.f32 %v1642_v6, %v1921_v58  ;;  %v536_v63 = vsub.f32 1.0, %v534_v57  ;;  %v552_v34 = vsub.f32 %v1652_v10, %v1921_v58 }
  0x87   : > { %v505_v47 = vsub.f32 %v1639_v5, %v1927_v3  ;;  %v513_v31 = vsub.f32 1.0, %v511_v17  ;;  %v529_v59 = vsub.f32 %v1645_v7, %v1927_v3  ;;  %v537_v16 = vsub.f32 1.0, %v535_v1 }
  0x88   : > { %v514_v21 = vmul.f32 %v512_v4, %v512_v4  ;;  %v538_v8 = vmul.f32 %v536_v63, %v536_v63  ;;  %v553_v2 = vsub.f32 %v1655_v11, %v1927_v3  ;;  %v560_v6 = vsub.f32 1.0, %v558_v52 }
  0x89   : > { %v515_v19 = vmul.f32 %v513_v31, %v513_v31  ;;  %v539_v48 = vmul.f32 %v537_v16, %v537_v16  ;;  %v561_v57 = vsub.f32 1.0, %v559_v30  ;;  %v576_v5 = vsub.f32 %v1658_v14, %v1921_v58 }
  0x8a   : > { %v520_v44 = vmul.f32 %v514_v21, %v504_v46  ;;  %v544_v18 = vmul.f32 %v538_v8, %v528_v51  ;;  %v577_v7 = vsub.f32 %v1661_v15, %v1927_v3  ;;  %v562_v4 = vmul.f32 %v560_v6, %v560_v6 }
  0x8b   : > { %v521_v17 = vmul.f32 %v515_v19, %v505_v47  ;;  %v545_v1 = vmul.f32 %v539_v48, %v529_v59  ;;  %v563_v63 = vmul.f32 %v561_v57, %v561_v57  ;;  %v2210_v31 = vunpack.c.l.bf16 %v1834_v38 }
  0x8c   : > { %v522_v10 = vmul.f32 %v520_v44, %v1844_v20  ;;  %v546_v11 = vmul.f32 %v544_v18, %v1855_v27  ;;  %v2211_v30 = vunpack.c.h.bf16 %v1834_v38  ;;  %v568_v51 = vmul.f32 %v562_v4, %v552_v34 }
  0x8d   : > { %v582_v52 = vmul.f32 %v1911_v55, %v2210_v31  ;;  %v523_v14 = vmul.f32 %v521_v17, %v1847_v53  ;;  %v547_v15 = vmul.f32 %v545_v1, %v1865_v36  ;;  %v569_v48 = vmul.f32 %v563_v63, %v553_v2 }
  0x8e   : > { %v583_v46 = vmul.f32 %v1918_v62, %v2211_v30  ;;  %v548_v47 = vadd.f32 %v546_v11, %v522_v10  ;;  %v600_v20 = vsub.f32 %v1672_v22, %v1921_v58  ;;  %v570_v18 = vmul.f32 %v568_v51, %v1869_v37 }
  0x8f   : > { %v584_v59 = vsub.f32 1.0, %v582_v52  ;;  %v549_v27 = vadd.f32 %v547_v15, %v523_v14  ;;  %v571_v44 = vmul.f32 %v569_v48, %v1872_v41  ;;  %v601_v38 = vsub.f32 %v1675_v23, %v1927_v3 }
  0x90   : > { %v585_v16 = vsub.f32 1.0, %v583_v46  ;;  %v2212_v36 = vunpack.c.l.bf16 %v1836_v42  ;;  %v2213_v34 = vunpack.c.h.bf16 %v1836_v42  ;;  %v572_v22 = vadd.f32 %v570_v18, %v548_v47 }
  0x91   : > { %v586_v21 = vmul.f32 %v584_v59, %v584_v59  ;;  %v573_v19 = vadd.f32 %v571_v44, %v549_v27  ;;  %v624_v37 = vsub.f32 %v1680_v24, %v1921_v58  ;;  %v625_v41 = vsub.f32 %v1683_v25, %v1927_v3 }
  0x92   : > { %v587_v53 = vmul.f32 %v585_v16, %v585_v16  ;;  %v606_v8 = vmul.f32 %v1911_v55, %v2212_v36  ;;  %v607_v2 = vmul.f32 %v1918_v62, %v2213_v34  ;;  %v2214_v1 = vunpack.c.l.bf16 %v1838_v12 }
  0x93   : > { %v592_v23 = vmul.f32 %v586_v21, %v576_v5  ;;  %v2215_v42 = vunpack.c.h.bf16 %v1838_v12  ;;  %v648_v10 = vsub.f32 %v1688_v28, %v1921_v58  ;;  %v649_v24 = vsub.f32 %v1691_v29, %v1927_v3 }
  0x94   : > { %v593_v6 = vmul.f32 %v587_v53, %v577_v7  ;;  %v608_v57 = vsub.f32 1.0, %v606_v8  ;;  %v609_v17 = vsub.f32 1.0, %v607_v2  ;;  %v630_v4 = vmul.f32 %v1911_v55, %v2214_v1 }
  0x95   : > { %v631_v63 = vmul.f32 %v1918_v62, %v2215_v42  ;;  %v594_v25 = vmul.f32 %v592_v23, %v1877_v45  ;;  %v2216_v52 = vunpack.c.l.bf16 %v1849_v60  ;;  %v2217_v29 = vunpack.c.h.bf16 %v1849_v60 }
  0x96   : > { %v595_v5 = vmul.f32 %v593_v6, %v1881_v43  ;;  %v610_v7 = vmul.f32 %v608_v57, %v608_v57  ;;  %v611_v11 = vmul.f32 %v609_v17, %v609_v17  ;;  %v632_v12 = vsub.f32 1.0, %v630_v4 }
  0x97   : > { %v633_v31 = vsub.f32 1.0, %v631_v63  ;;  %v654_v28 = vmul.f32 %v1911_v55, %v2216_v52  ;;  %v655_v30 = vmul.f32 %v1918_v62, %v2217_v29  ;;  %v596_v45 = vadd.f32 %v594_v25, %v572_v22 }
  0x98   : > { %v597_v43 = vadd.f32 %v595_v5, %v573_v19  ;;  %v616_v46 = vmul.f32 %v610_v7, %v600_v20  ;;  %v617_v14 = vmul.f32 %v611_v11, %v601_v38  ;;  %v634_v15 = vmul.f32 %v632_v12, %v632_v12 }
  0x99   : > { %v635_v51 = vmul.f32 %v633_v31, %v633_v31  ;;  %v656_v48 = vsub.f32 1.0, %v654_v28  ;;  %v657_v47 = vsub.f32 1.0, %v655_v30  ;;  %v1157_v16 = vunpack.c.l.bf16 %v1885_v50 }
  0x9a   : > { %v618_v59 = vmul.f32 %v616_v46, %v1892_v56  ;;  %v619_v60 = vmul.f32 %v617_v14, %v1897_v61  ;;  %v719_v27 = vlaneseq  ;;  %v640_v18 = vmul.f32 %v634_v15, %v624_v37 }
  0x9b   : > { %v641_v20 = vmul.f32 %v635_v51, %v625_v41  ;;  %v658_v44 = vmul.f32 %v656_v48, %v656_v48  ;;  %v659_v38 = vmul.f32 %v657_v47, %v657_v47  ;;  %v2218_v61 = vunpack.c.l.bf16 %v1862_v35 }
  0x9c   : > { %v620_v21 = vadd.f32 %v618_v59, %v596_v45  ;;  %v621_v56 = vadd.f32 %v619_v60, %v597_v43  ;;  %v2219_v36 = vunpack.c.h.bf16 %v1862_v35  ;;  %v642_v34 = vmul.f32 %v640_v18, %v1901_v0 }
  0x9d   : > { %v678_v53 = vmul.f32 %v1911_v55, %v2218_v61  ;;  %v643_v2 = vmul.f32 %v641_v20, %v1905_v9  ;;  %v664_v22 = vmul.f32 %v658_v44, %v648_v10  ;;  %v665_v19 = vmul.f32 %v659_v38, %v649_v24 }
  0x9e   : > { %v679_v8 = vmul.f32 %v1918_v62, %v2219_v36  ;;  %v1158_v35 = vunpack.c.h.bf16 %v1885_v50  ;;  %v722_v23 = vstv %s1057_s27  ;;  %v644_v6 = vadd.f32 %v642_v34, %v620_v21  ;;  %s2071_s27 = sld [smem:[#allocation4 + %s794_s28]]  ;;  %s261_s28 = scalar_lea.vmem [#allocation10], %s1006_s6 }
  0x9f   : > { %v680_v37 = vsub.f32 1.0, %v678_v53  ;;  %v672_v0 = vsub.f32 %v1696_v32, %v1921_v58  ;;  %v673_v9 = vsub.f32 %v1699_v33, %v1927_v3  ;;  %v2033_v57 = vshrl.u32 %v719_v27, 7 }
  0xa0   : > { %v681_v41 = vsub.f32 1.0, %v679_v8  ;;  %v666_v17 = vmul.f32 %v664_v22, %v1909_v13  ;;  %v702_v4 = vmul.f32 %v1911_v55, %v1157_v16  ;;  %v645_v42 = vadd.f32 %v643_v2, %v621_v56 }
  0xa1   : > { %v682_v50 = vmul.f32 %v680_v37, %v680_v37  ;;  %v667_v32 = vmul.f32 %v665_v19, %v1914_v26  ;;  %v2220_v63 = vmov -2.5e-07   ;;  %v703_v10 = vmul.f32 %v1918_v62, %v1158_v35 }
  0xa2   : > { %v683_v1 = vmul.f32 %v681_v41, %v681_v41  ;;  %v686_v33 = vsel %vm684_vm2, -0.25000024, %v2220_v63  ;;  %v687_v13 = vsel %vm685_vm3, -0.25000024, %v2220_v63  ;;  %v704_v55 = vsub.f32 1.0, %v702_v4 }
  0xa3   : > { %v2055_v24 = vand.u32 127, %v719_v27  ;;  %v696_v26 = vsub.f32 %v1705_v39, %v1921_v58  ;;  %v721_v25 = vadd.s32 8, %v2033_v57  ;;  %v723_v5 = vadd.s32 %v722_v23, %v2033_v57 }
  0xa4   : > { %v2067_v62 = vadd.f32 %v666_v17, %v644_v6  ;;  %v688_v7 = vmul.f32 %v682_v50, %v672_v0  ;;  %v689_v11 = vmul.f32 %v683_v1, %v673_v9  ;;  %v697_v12 = vsub.f32 %v1708_v40, %v1927_v3 }
  0xa5   : > { %v2073_v31 = vadd.f32 %v667_v32, %v645_v42  ;;  %v724_v39 = vadd.s32 %v722_v23, %v721_v25  ;;  %v735_v58 = vstv %s2017_s14  ;;  %v738_v52 = vstv %s2022_s10  ;;  %s2095_s14 = sld [smem:[#allocation4 + %s2027_s13]]  ;;  %s873_s10 = sadd.s32 %s1447_s19, %s1070_s5 }
  0xa6   : > { %v705_v28 = vsub.f32 1.0, %v703_v10  ;;  %v706_v29 = vmul.f32 %v704_v55, %v704_v55  ;;  %v2083_v30 = vsel %vm708_vm4, -0.25000024, %v2220_v63  ;;  %vm736_vm6 = vcmp.ge.s32.totalorder %v723_v5, %v735_v58  ;;  %s1071_s13 = sshll.u32 %s873_s10, 3 }
  0xa7   : > { %vm2086_vm7 = vcmp.ge.s32.totalorder %v724_v39, %v735_v58  ;;  %vm739_vm8 = vcmp.lt.s32.totalorder %v723_v5, %v738_v52  ;;  %vm2090_vm9 = vcmp.lt.s32.totalorder %v724_v39, %v738_v52  ;;  %v690_v45 = vmul.f32 %v688_v7, %v686_v33 }
  0xa8   : > { %v691_v43 = vmul.f32 %v689_v11, %v687_v13  ;;  %vm741_vm10 = vmand %vm736_vm6, %vm739_vm8  ;;  %v749_v46 = vstv %s2035_s15  ;;  %v1475_v14 = vmov 0.0   ;;  %vm748_vm12 = vcmp.ge.s32.totalorder %v2055_v24, %v747_v49 }
  0xa9   : > { %vm742_vm11 = vmand %vm2086_vm7, %vm2090_vm9  ;;  %v1058_v15 = vsel %vm741_vm10, 1.0, %v1475_v14  ;;  %vm750_vm13 = vcmp.lt.s32.totalorder %v2055_v24, %v749_v46  ;;  %v768_v51 = vstv %s2048_s1  ;;  %v707_v48 = vmul.f32 %v705_v28, %v705_v28 }
  0xaa   : > { %v712_v47 = vmul.f32 %v706_v29, %v696_v26  ;;  %v1059_v59 = vsel %vm742_vm11, 1.0, %v1475_v14  ;;  %vm751_vm14 = vmand %vm748_vm12, %vm750_vm13  ;;  %vm2108_vm15 = vcmp.ge.s32.totalorder %v723_v5, %v768_v51  ;;  %vm2112_vm0 = vcmp.ge.s32.totalorder %v724_v39, %v768_v51 }
  0xab   : > { %v1060_v16 = vsel %vm751_vm14, 1.0, %v1475_v14  ;;  %v771_v18 = vstv %s2065_s24  ;;  %v780_v20 = vstv %s2041_s26  ;;  %v782_v21 = vstv %s2057_s8  ;;  %s875_s26 = scalar_lea.hbm %s2188_s3, %s1071_s13  ;;  %s877_s8 = sshll.u32 %s261_s28, 4  ;;  %s878_s8 = int_to_ptr.vmem [resolvable:$true] %s877_s8 }
  0xac   : > { %v754_v44 = vmul.f32 %v1060_v16, %v1058_v15  ;;  %v755_v38 = vmul.f32 %v1060_v16, %v1059_v59  ;;  %vm772_vm1 = vcmp.lt.s32.totalorder %v723_v5, %v771_v18  ;;  %vm773_vm2 = vcmp.lt.s32.totalorder %v724_v39, %v771_v18  ;;  %s879_s19 = sshll.u32 %s875_s26, 4  ;;  %s880_s19 = int_to_ptr.hbm [resolvable:$true] %s879_s19 }
  0xad   : > { %vm774_vm3 = vmand %vm2108_vm15, %vm772_vm1  ;;  %vm781_vm4 = vcmp.ge.s32.totalorder %v2055_v24, %v780_v20  ;;  %v800_v56 = vstv %s2071_s27  ;;  %v803_v61 = vstv %s2078_s12  ;;  %vm783_vm7 = vcmp.lt.s32.totalorder %v2055_v24, %v782_v21  ;;  %s1373_s24 = sshra.s32 %s880_s19, 4  ;;  %s1374_s24 = int_to_ptr.hbm [resolvable:$true] %s1373_s24 }
  0xae   : > { %v756_v53 = vmax.f32 %v754_v44, 0.0  ;;  %v757_v36 = vmax.f32 %v755_v38, 0.0  ;;  %vm775_vm6 = vmand %vm2112_vm0, %vm773_vm2  ;;  %v1062_v8 = vsel %vm774_vm3, 1.0, %v1475_v14  ;;  %vm801_vm9 = vcmp.ge.s32.totalorder %v723_v5, %v800_v56  ;;  %s1375_s27 = scalar_lea.hbm %s1374_s24, 8  ;;  %p1380_p6 = scmp.lt.s32.totalorder %s1374_s24, %s2188_s3 }
  0xaf   : > { %v1063_v34 = vsel %vm775_vm6, 1.0, %v1475_v14  ;;  %vm784_vm8 = vmand %vm781_vm4, %vm783_vm7  ;;  %vm802_vm10 = vcmp.ge.s32.totalorder %v724_v39, %v800_v56  ;;  %vm804_vm11 = vcmp.lt.s32.totalorder %v723_v5, %v803_v61  ;;  %vm805_vm12 = vcmp.lt.s32.totalorder %v724_v39, %v803_v61  ;;  %p1376_p3 = scmp.ne.s32.totalorder %s1374_s24, %s1375_s27 }
  0xb0   : > { %v1064_v2 = vsel %vm784_vm8, 1.0, %v1475_v14  ;;  %vm806_vm13 = vmand %vm801_vm9, %vm804_vm11  ;;  %v812_v22 = vstv %s2095_s14  ;;  %v814_v19 = vstv %s2099_s25  ;;  %v713_v37 = vmul.f32 %v707_v48, %v697_v12  ;;  %s1379_s14 = scalar_lea.hbm %s2188_s3, 32 }
  0xb1   : > { %v787_v41 = vmul.f32 %v1064_v2, %v1062_v8  ;;  %v788_v35 = vmul.f32 %v1064_v2, %v1063_v34  ;;  %vm807_vm14 = vmand %vm802_vm10, %vm805_vm12  ;;  %vm813_vm15 = vcmp.ge.s32.totalorder %v2055_v24, %v812_v22  ;;  %v711_v23 = vsel %vm709_vm5, -0.25000024, %v2220_v63  ;;  %p1377_p4 = pnand %p1376_p3, %p1563_p9  ;;  %p1381_p7 = scmp.lt.s32.totalorder %s1379_s14, %s1375_s27 }
  0xb2   : > { %v1066_v6 = vsel %vm806_vm13, 1.0, %v1475_v14  ;;  %v1067_v0 = vsel %vm807_vm14, 1.0, %v1475_v14  ;;  %vm815_vm0 = vcmp.lt.s32.totalorder %v2055_v24, %v814_v19  ;;  %v692_v50 = vadd.f32 %v690_v45, %v2067_v62 }
  0xb3   : > { %v789_v9 = vmax.f32 %v756_v53, %v787_v41  ;;  %v790_v17 = vmax.f32 %v757_v36, %v788_v35  ;;  %vm816_vm1 = vmand %vm813_vm15, %vm815_vm0  ;;  %v693_v1 = vadd.f32 %v691_v43, %v2073_v31  ;;  %v714_v42 = vmul.f32 %v712_v47, %v2083_v30  ;;  %p1378_p5 = pneg %p1377_p4  ;;  %p1382_p8 = por %p1381_p7, %p1380_p6 }
  0xb4   : > { %v1068_v4 = vsel %vm816_vm1, 1.0, %v1475_v14  ;;  %v715_v32 = vmul.f32 %v713_v37, %v711_v23  ;;  %vm852_vm5 = vcmp.eq.s32.totalorder %v2033_v57, 0  ;;  %vm855_vm2 = vcmp.eq.s32.totalorder %v2055_v24, 1 }
  0xb5   : > { %v819_v33 = vmul.f32 %v1068_v4, %v1066_v6  ;;  %v820_v13 = vmul.f32 %v1068_v4, %v1067_v0  ;;  %v716_v63 = vadd.f32 %v714_v42, %v692_v50  ;;  %vm853_vm3 = vcmp.eq.s32.totalorder %v2055_v24, 0  ;;  %vm856_vm4 = vmand %vm852_vm5, %vm855_vm2  ;;  %p1383_p10 = pnand %p1382_p8, %p1378_p5 }
  0xb6   : > { %v717_v55 = vadd.f32 %v715_v32, %v693_v1  ;;  %vm854_vm6 = vmand %vm852_vm5, %vm853_vm3 }
  0xb7   : > { %v821_v10 = vmax.f32 %v789_v9, %v819_v33  ;;  %v822_v54 = vmax.f32 %v790_v17, %v820_v13 }
  0xb9   : > { %v823_v26 = vmul.f32 12.0, %v821_v10  ;;  %v824_v25 = vmul.f32 12.0, %v822_v54 }
  0xbb   : > { %v825_v5 = vadd.f32 1.0, %v823_v26  ;;  %v826_v7 = vadd.f32 1.0, %v824_v25 }
  0xbd   : > { %v827_v11 = vmul.f32 %v825_v5, %v716_v63  ;;  %v828_v12 = vmul.f32 %v826_v7, %v717_v55 }
  0xbf   : > { %v829_v39 = vmul.f32 %v827_v11, %v821_v10  ;;  %v830_v62 = vmul.f32 %v828_v12, %v822_v54  ;;  %v841_v31 = vadd.f32 %v828_v12, %v827_v11 }
  0xc1   : > { %v831_v58 = vadd.f32 %v830_v62, %v829_v39 }
  0xc3   : > { %832 = vadd.xlane.f32.xlu0 %v831_v58 }
  0xcb   : > { %842 = vadd.xlane.f32.xlu0 %v841_v31 }
 0x136   : > { %v833_v52 = vpop.xlane.xlu0 %832 }
 0x137   : > { %v834_v28 = vrot.slane %v833_v52, 4 }
 0x139   : > { %v835_v29 = vadd.f32 %v834_v28, %v833_v52 }
 0x13b   : > { %v836_v30 = vrot.slane %v835_v29, 2 }
 0x13d   : > { %v837_v40 = vadd.f32 %v836_v30, %v835_v29 }
 0x13e   : > { %v843_v3 = vpop.xlane.xlu0 %842 }
 0x13f   : > { %v844_v45 = vrot.slane %v843_v3, 4  ;;  %v838_v43 = vrot.slane %v837_v40, 1 }
 0x141   : > { %v845_v49 = vadd.f32 %v844_v45, %v843_v3  ;;  %v839_v46 = vadd.f32 %v838_v43, %v837_v40 }
 0x143   : > { %v846_v14 = vrot.slane %v845_v49, 2  ;;  %1174 = vpush %v839_v46 }
 0x145   : > { %v847_v15 = vadd.f32 %v846_v14, %v845_v49 }
 0x147   : > { %v848_v51 = vrot.slane %v847_v15, 1 }
 0x149   : > { %v849_v48 = vadd.f32 %v848_v51, %v847_v15 }
 0x14b   : > { %1176 = vpush %v849_v48 }
 0x174   : > { %s1175_s9 = spop %1174 }
 0x175   : > { %v859_v57 = vstv %s1175_s9 }
 0x17c   : > { %s1177_s1 = spop %1176 }
 0x17d   : > { %s851_s29 = ssub.f32 %s1177_s1, %s1175_s9 }
 0x17f   : > { %v857_v47 = vstv %s851_s29 }
 0x180   : > { %v858_v59 = vsel %vm856_vm4, %v857_v47, 0.0 }
 0x181   : > { %v860_v60 = vsel %vm854_vm6, %v859_v57, %v858_v59 }
 0x182   : > { %861 = vst [vmem:[%s261_s28] sm:$0xff] %v860_v60 }
 0x183   : > { %1386 = shalt.err (!%p1383_p10)
}
 0x184   : > { %1189 = dma.vmem_to_hbm [thread:$0]  (%p1563_p9), %s878_s8, 128, %s880_s19, %s863_s0  }
 0x185 PF: > { %p1195_p11 = scmp.ge.s32.totalorder %s1463_s22, 2  ;;  %s891_s11 = sand.u32 1, %s1435_s16  }
 0x186   : > { %s892_s10 = scalar_lea.sflag [#allocation7], %s891_s11 }
 0x187   : > { %p1192_p13 = pnand %p1195_p11, %p1570_p12 }
 0x189   : > { %p1193_p0 = pneg %p1192_p13 }
 0x18b   : > { %1430 = dma.done.wait (%p1193_p0), %s892_s10, 128  }
 0x18c   : > { %1432 = vsyncadd (%p1193_p0), %s892_s10, 4294967168  ;;  %s30_s22 = sadd.s32 1, %s1463_s22   ;;  %s2229_s6 = sld [smem:[#allocation20_spill]] }
 0x18d   : > { %p27_p1 = scmp.ge.s32.totalorder %s30_s22, 6   ;;  %s2230_s30 = sld [smem:[#allocation18_spill]] }
 0x18e   : > { %s2231_s13 = sld [smem:[#allocation19_spill]]  ;;  %s2232_s16 = smov %s1439_s17 }
 0x18f   : > { %s2233_s17 = smov %s1443_s18  ;;  %s2235_s19 = smov %s1455_s20 }
 0x190   : > { %s2236_s0 = smov %s1459_s21  ;;  %29 = sbr.rel (!%p27_p1) target bundleno = 15 (0xf), region = 107 }
 0x192   : > { %s2234_s18 = smov %s2229_s6 }
 0x193   : > { %s2237_s20 = smov %s2230_s30 }
 0x194   : > { %s2238_s21 = smov %s2231_s13 }
 0x195   :  { %898 = vsyncpa [#allocation6], 1 }
 0x196   :  { %900 = vsyncpa [#allocation6 + $0x1], 1 }
 0x197   :  { %901 = vsyncpa [#allocation9], 1 }
 0x198   :  { %903 = vsyncpa [#allocation9 + $0x1], 1 }
 0x199   :  { %904 = vsyncpa [#allocation7], 1 }
 0x19a   :  { %906 = vsyncpa [#allocation7 + $0x1], 1 }

</bundles_post_ra>
